<compile_context>
chip_gen: v5e
topology: v5e:2x2
jax: 0.10.0
libtpu: 0.0.40
codegen_flags: <defaults>
</compile_context>

<pallas_src>
import functools

import jax
import jax.numpy as jnp
from jax.experimental import pallas as pl
from jax.experimental.pallas import tpu as pltpu


# ----------------------------------------------------------------------------
# Small helpers
# ----------------------------------------------------------------------------
def _round_up(x, m):
    return ((x + m - 1) // m) * m


def _pick_time_chunk(seq_len, cap=32):
    """Largest divisor of seq_len that is <= cap (chunked time axis)."""
    t = min(seq_len, cap)
    while seq_len % t:
        t -= 1
    return t


def _pick_batch_block(b_pad, cap=128):
    """Largest multiple-of-8 divisor of b_pad <= cap; prefer >=2 blocks
    (v7x megacore) when the batch is big enough."""
    limit = min(cap, b_pad if b_pad < 16 else b_pad // 2)
    best = 8
    for bb in range(8, limit + 1, 8):
        if b_pad % bb == 0:
            best = bb
    return best


def _pad_gate_cols(w, h, h_pad):
    """Pad each of the 4 stacked gate blocks along the last dim H -> H_pad."""
    if h_pad == h:
        return w
    blocks = [jnp.pad(w[:, k * h:(k + 1) * h], ((0, 0), (0, h_pad - h)))
              for k in range(4)]
    return jnp.concatenate(blocks, axis=1)


def _pad_rows(w, rows_pad):
    if w.shape[0] == rows_pad:
        return w
    return jnp.pad(w, ((0, rows_pad - w.shape[0]), (0, 0)))


# ----------------------------------------------------------------------------
# Pallas kernel: one LSTM layer, one (batch_block, time_chunk) grid step.
# ----------------------------------------------------------------------------
def _lstm_layer_kernel(x_ref, h0_ref, c0_ref, wx_ref, wh_ref, b_ref,
                       out_ref, cn_ref, h_sc, c_sc, *, hidden, t_chunk):
    ck = pl.program_id(1)

    # Initialize recurrent state at the first chunk of this batch block.
    @pl.when(ck == 0)
    def _():
        h_sc[...] = h0_ref[...].astype(jnp.float32)
        c_sc[...] = c0_ref[...].astype(jnp.float32)

    H = hidden
    T = t_chunk
    BB = h0_ref.shape[0]
    In = x_ref.shape[-1]
    w_dtype = wx_ref.dtype

    # --- Hoisted, non-recurrent input projection for the whole chunk ------
    # One well-shaped MXU matmul (M = T*BB) instead of T tiny ones.
    x_flat = x_ref[...].reshape(T * BB, In).astype(w_dtype)
    xg = jnp.dot(x_flat, wx_ref[...], preferred_element_type=jnp.float32)
    xg = (xg + b_ref[...].astype(jnp.float32)).reshape(T, BB, 4 * H)

    wh = wh_ref[...]
    h = h_sc[...]
    c = c_sc[...]

    outs = []
    # Statically unrolled recurrence (T is a compile-time constant): only the
    # sequentially-dependent h @ Wh stays inside the loop.
    for t in range(T):
        g = xg[t] + jnp.dot(h.astype(w_dtype), wh,
                            preferred_element_type=jnp.float32)
        i_g = jax.nn.sigmoid(g[:, 0 * H:1 * H])
        f_g = jax.nn.sigmoid(g[:, 1 * H:2 * H])
        o_g = jax.nn.sigmoid(g[:, 2 * H:3 * H])
        g_c = jnp.tanh(g[:, 3 * H:4 * H])
        c = f_g * c + i_g * g_c
        h = o_g * jnp.tanh(c)
        outs.append(h)

    h_sc[...] = h
    c_sc[...] = c
    # One big lane-dense store for the whole chunk.
    out_ref[...] = jnp.stack(outs, axis=0).astype(out_ref.dtype)

    @pl.when(ck == pl.num_programs(1) - 1)
    def _():
        cn_ref[...] = c.astype(cn_ref.dtype)


def _lstm_layer(x_sbf, h0, c0, wx, wh, b, t_chunk):
    """One LSTM layer.

    x_sbf: (S, B_pad, In)  (seq-major, batch padded)
    h0, c0: (B_pad, H_pad)
    wx: (In, 4*H_pad), wh: (H_pad, 4*H_pad), b: (1, 4*H_pad)
    returns: out (S, B_pad, H_pad), c_n (B_pad, H_pad)
    """
    S, Bp, In = x_sbf.shape
    Hp = wh.shape[0]
    dtype = x_sbf.dtype
    n_chunks = S // t_chunk
    bb = _pick_batch_block(Bp)
    n_bblocks = Bp // bb

    kernel = functools.partial(_lstm_layer_kernel, hidden=Hp, t_chunk=t_chunk)

    # TODO(synk): for very large H on v7x (64 MiB VMEM) the resident
    # (H_pad, 4*H_pad) weight block may need an extra grid axis over 4H or
    # bf16 weights; shapes here fit comfortably under the default budget.
    out, c_n = pl.pallas_call(
        kernel,
        out_shape=(
            jax.ShapeDtypeStruct((S, Bp, Hp), dtype),
            jax.ShapeDtypeStruct((Bp, Hp), dtype),
        ),
        grid_spec=pltpu.PrefetchScalarGridSpec(
            num_scalar_prefetch=0,
            grid=(n_bblocks, n_chunks),
            in_specs=[
                pl.BlockSpec((t_chunk, bb, In), lambda i, k: (k, i, 0)),  # x chunk
                pl.BlockSpec((bb, Hp), lambda i, k: (i, 0)),              # h0
                pl.BlockSpec((bb, Hp), lambda i, k: (i, 0)),              # c0
                pl.BlockSpec((In, 4 * Hp), lambda i, k: (0, 0)),          # Wx
                pl.BlockSpec((Hp, 4 * Hp), lambda i, k: (0, 0)),          # Wh
                pl.BlockSpec((1, 4 * Hp), lambda i, k: (0, 0)),           # bias
            ],
            out_specs=[
                pl.BlockSpec((t_chunk, bb, Hp), lambda i, k: (k, i, 0)),  # out
                pl.BlockSpec((bb, Hp), lambda i, k: (i, 0)),              # c_n
            ],
            scratch_shapes=[
                pltpu.VMEM((bb, Hp), jnp.float32),  # h carry
                pltpu.VMEM((bb, Hp), jnp.float32),  # c carry
            ],
        ),
        compiler_params=pltpu.CompilerParams(
            dimension_semantics=("parallel", "arbitrary")),
    )(x_sbf, h0, c0, wx, wh, b)
    return out, c_n


# ----------------------------------------------------------------------------
# Parameter init (mirrors LSTMCell.reset_parameters: Xavier weights, zero bias)
# ----------------------------------------------------------------------------
def init_lstm_params(key, input_size, hidden_size, num_layers, dtype=jnp.float32):
    params = []
    for layer in range(num_layers):
        in_feat = input_size if layer == 0 else hidden_size
        combined = in_feat + hidden_size
        bound = (6.0 / (combined + hidden_size)) ** 0.5  # xavier_uniform
        gate_wx, gate_wh = [], []
        for _ in range(4):  # input, forget, output, candidate
            key, sub = jax.random.split(key)
            w = jax.random.uniform(sub, (hidden_size, combined),
                                   minval=-bound, maxval=bound,
                                   dtype=jnp.float32)
            gate_wx.append(w[:, :in_feat].T)   # (in_feat, H)
            gate_wh.append(w[:, in_feat:].T)   # (H, H)
        wx = jnp.concatenate(gate_wx, axis=1).astype(dtype)   # (in_feat, 4H)
        wh = jnp.concatenate(gate_wh, axis=1).astype(dtype)   # (H, 4H)
        b = jnp.zeros((1, 4 * hidden_size), dtype=dtype)      # zero bias
        params.append((wx, wh, b))
    return params


# ----------------------------------------------------------------------------
# Full multi-layer LSTM forward (matches LSTM.forward semantics).
# ----------------------------------------------------------------------------
def lstm_forward(x, params, hidden_size, hx=None, weight_dtype=None,
                 t_chunk_cap=32):
    """x: (batch, seq, input) -> (outputs (B,S,H), (h_n, c_n) each (L,B,H))."""
    B, S, _ = x.shape
    L = len(params)
    H = hidden_size
    dtype = x.dtype

    H_pad = _round_up(H, 128)   # lane-dense output / 128-aligned gate slices
    B_pad = _round_up(B, 8)     # f32 sublane alignment

    if hx is None:
        h0 = jnp.zeros((L, B_pad, H_pad), dtype)
        c0 = jnp.zeros((L, B_pad, H_pad), dtype)
    else:
        h0_u, c0_u = hx
        h0 = jnp.zeros((L, B_pad, H_pad), dtype).at[:, :B, :H].set(
            h0_u.astype(dtype))
        c0 = jnp.zeros((L, B_pad, H_pad), dtype).at[:, :B, :H].set(
            c0_u.astype(dtype))

    # Sequence-major, batch-padded layout for the kernel.
    x_sbf = jnp.transpose(x, (1, 0, 2))
    if B_pad != B:
        x_sbf = jnp.pad(x_sbf, ((0, 0), (0, B_pad - B), (0, 0)))

    t_chunk = _pick_time_chunk(S, t_chunk_cap)

    output = x_sbf
    h_fin, c_fin = [], []
    for layer_idx, (wx, wh, b) in enumerate(params):
        in_feat = wx.shape[0]
        in_pad = in_feat if layer_idx == 0 else H_pad
        wx_p = _pad_rows(_pad_gate_cols(wx, H, H_pad), in_pad)
        wh_p = _pad_rows(_pad_gate_cols(wh, H, H_pad), H_pad)
        b_p = _pad_gate_cols(b, H, H_pad)
        if weight_dtype is not None:
            wx_p = wx_p.astype(weight_dtype)
            wh_p = wh_p.astype(weight_dtype)
        output, c_n = _lstm_layer(output, h0[layer_idx], c0[layer_idx],
                                  wx_p, wh_p, b_p, t_chunk)
        h_fin.append(output[-1][None])   # last timestep hidden == h_n[layer]
        c_fin.append(c_n[None])
        # TODO(synk): inter-layer dropout (self.dropout > 0) not implemented;
        # the module defaults to dropout=0.0 so forward semantics are unchanged.

    outputs = jnp.transpose(output, (1, 0, 2))[:B, :, :H]     # (B, S, H)
    h_n = jnp.concatenate(h_fin, 0)[:, :B, :H]
    c_n = jnp.concatenate(c_fin, 0)[:, :B, :H]
    return outputs, (h_n, c_n)


# ----------------------------------------------------------------------------
# Pure-JAX reference for verification.
# ----------------------------------------------------------------------------
def lstm_reference(x, params, hidden_size, hx=None):
    B, S, _ = x.shape
    L = len(params)
    if hx is None:
        h0 = jnp.zeros((L, B, hidden_size), jnp.float32)
        c0 = jnp.zeros((L, B, hidden_size), jnp.float32)
    else:
        h0, c0 = hx
    output = x
    h_fin, c_fin = [], []
    for layer_idx, (wx, wh, b) in enumerate(params):
        h = h0[layer_idx].astype(jnp.float32)
        c = c0[layer_idx].astype(jnp.float32)
        outs = []
        for t in range(S):
            g = output[:, t, :].astype(jnp.float32) @ wx + h @ wh + b
            H = hidden_size
            i = jax.nn.sigmoid(g[:, :H])
            f = jax.nn.sigmoid(g[:, H:2 * H])
            o = jax.nn.sigmoid(g[:, 2 * H:3 * H])
            gg = jnp.tanh(g[:, 3 * H:])
            c = f * c + i * gg
            h = o * jnp.tanh(c)
            outs.append(h[:, None, :])
        output = jnp.concatenate(outs, axis=1)
        h_fin.append(h[None])
        c_fin.append(c[None])
    return output, (jnp.concatenate(h_fin, 0), jnp.concatenate(c_fin, 0))


if __name__ == "__main__":
    key = jax.random.PRNGKey(0)

    # --- Test 1: shapes matching the module's forward signature -------------
    batch, seq_len, input_size, hidden_size, num_layers = 2, 8, 4, 32, 2
    key, kx = jax.random.split(key)
    x = jax.random.normal(kx, (batch, seq_len, input_size), dtype=jnp.float32)
    params = init_lstm_params(key, input_size, hidden_size, num_layers)

    outputs, (h_n, c_n) = lstm_forward(x, params, hidden_size)
    jax.block_until_ready(outputs)
    jax.block_until_ready(h_n)
    jax.block_until_ready(c_n)

    ref_out, (ref_h, ref_c) = lstm_reference(x, params, hidden_size)
    assert outputs.shape == (batch, seq_len, hidden_size)
    assert h_n.shape == (num_layers, batch, hidden_size)
    assert c_n.shape == (num_layers, batch, hidden_size)
    assert jnp.allclose(outputs, ref_out, atol=1e-4)
    assert jnp.allclose(h_n, ref_h, atol=1e-4)
    assert jnp.allclose(c_n, ref_c, atol=1e-4)

    # --- Test 2: ragged shapes (batch/hidden padding, multi-chunk time, hx) -
    b2, s2, in2, h2, l2 = 3, 20, 10, 48, 2
    key, kx2, kh, kc = jax.random.split(key, 4)
    x2 = jax.random.normal(kx2, (b2, s2, in2), dtype=jnp.float32)
    params2 = init_lstm_params(key, in2, h2, l2)
    hx2 = (jax.random.normal(kh, (l2, b2, h2), dtype=jnp.float32) * 0.1,
           jax.random.normal(kc, (l2, b2, h2), dtype=jnp.float32) * 0.1)

    out2, (hn2, cn2) = lstm_forward(x2, params2, h2, hx=hx2, t_chunk_cap=8)
    jax.block_until_ready(out2)
    r_out2, (r_h2, r_c2) = lstm_reference(x2, params2, h2, hx=hx2)
    assert jnp.allclose(out2, r_out2, atol=1e-4)
    assert jnp.allclose(hn2, r_h2, atol=1e-4)
    assert jnp.allclose(cn2, r_c2, atol=1e-4)

    # --- Test 3: bf16 weights (f32 accumulation / elementwise), loose tol ---
    out_bf, (hn_bf, cn_bf) = lstm_forward(x, params, hidden_size,
                                          weight_dtype=jnp.bfloat16)
    jax.block_until_ready(out_bf)
    assert jnp.allclose(out_bf, ref_out, atol=1e-1)
    assert jnp.allclose(cn_bf, ref_c, atol=1e-1)

    print("KERNEL_OK")
</pallas_src>

<mosaic_0001>
module attributes {stable_mosaic.version = 11 : i64} {
  func.func @_lstm_layer_kernel(%arg0: i32, %arg1: i32, %arg2: memref<8x8x4xf32, #tpu.memory_space<vmem>>, %arg3: memref<8x128xf32, #tpu.memory_space<vmem>>, %arg4: memref<8x128xf32, #tpu.memory_space<vmem>>, %arg5: memref<4x512xf32, #tpu.memory_space<vmem>>, %arg6: memref<128x512xf32, #tpu.memory_space<vmem>>, %arg7: memref<1x512xf32, #tpu.memory_space<vmem>>, %arg8: memref<8x8x128xf32, #tpu.memory_space<vmem>>, %arg9: memref<8x128xf32, #tpu.memory_space<vmem>>, %arg10: memref<8x128xf32, #tpu.memory_space<vmem>>, %arg11: memref<8x128xf32, #tpu.memory_space<vmem>>) attributes {dimension_semantics = [#tpu.dimension_semantics<parallel>, #tpu.dimension_semantics<arbitrary>], iteration_bounds = array<i64: 1, 1>, scalar_prefetch = 0 : i64, scratch_operands = 2 : i64, tpu.core_type = #tpu.core_type<tc>, window_params = [{transform_indices = @transform_0, window_bounds = array<i64: 8, 8, 4>}, {transform_indices = @transform_1, window_bounds = array<i64: 8, 128>}, {transform_indices = @transform_2, window_bounds = array<i64: 8, 128>}, {pipeline_mode = #tpu.pipeline_mode<synchronous>, transform_indices = @transform_3, window_bounds = array<i64: 4, 512>}, {pipeline_mode = #tpu.pipeline_mode<synchronous>, transform_indices = @transform_4, window_bounds = array<i64: 128, 512>}, {pipeline_mode = #tpu.pipeline_mode<synchronous>, transform_indices = @transform_5, window_bounds = array<i64: 1, 512>}, {transform_indices = @transform_6, window_bounds = array<i64: 8, 8, 128>}, {transform_indices = @transform_7, window_bounds = array<i64: 8, 128>}]} {
    %c0_i32 = arith.constant 0 : i32
    %0 = arith.cmpi eq, %arg1, %c0_i32 : i32
    %1 = arith.extui %0 : i1 to i32
    %c0_i32_0 = arith.constant 0 : i32
    %2 = arith.cmpi ne, %1, %c0_i32_0 : i32
    scf.if %2 {
      %c0_54 = arith.constant 0 : index
      %c0_55 = arith.constant 0 : index
      %261 = vector.load %arg3[%c0_54, %c0_55] : memref<8x128xf32, #tpu.memory_space<vmem>>, vector<8x128xf32>
      %c0_56 = arith.constant 0 : index
      %c0_57 = arith.constant 0 : index
      %262 = vector.load %arg10[%c0_56, %c0_57] : memref<8x128xf32, #tpu.memory_space<vmem>>, vector<8x128xf32>
      tpu.vector_store %arg10[%c0_56, %c0_57], %261 {strides = array<i32>} : memref<8x128xf32, #tpu.memory_space<vmem>>, vector<8x128xf32>,
      %c0_58 = arith.constant 0 : index
      %c0_59 = arith.constant 0 : index
      %263 = vector.load %arg4[%c0_58, %c0_59] : memref<8x128xf32, #tpu.memory_space<vmem>>, vector<8x128xf32>
      %c0_60 = arith.constant 0 : index
      %c0_61 = arith.constant 0 : index
      %264 = vector.load %arg11[%c0_60, %c0_61] : memref<8x128xf32, #tpu.memory_space<vmem>>, vector<8x128xf32>
      tpu.vector_store %arg11[%c0_60, %c0_61], %263 {strides = array<i32>} : memref<8x128xf32, #tpu.memory_space<vmem>>, vector<8x128xf32>,
    } else {
    }
    %c0 = arith.constant 0 : index
    %c0_1 = arith.constant 0 : index
    %c0_2 = arith.constant 0 : index
    %3 = vector.load %arg2[%c0, %c0_1, %c0_2] : memref<8x8x4xf32, #tpu.memory_space<vmem>>, vector<8x8x4xf32>
    %4 = vector.shape_cast %3 : vector<8x8x4xf32> to vector<64x4xf32>
    %c0_3 = arith.constant 0 : index
    %c0_4 = arith.constant 0 : index
    %5 = vector.load %arg5[%c0_3, %c0_4] : memref<4x512xf32, #tpu.memory_space<vmem>>, vector<4x512xf32>
    %cst = arith.constant dense<0.000000e+00> : vector<64x512xf32>
    %6 = tpu.matmul %4, %5, %cst {dimension_numbers = #tpu.dot_dimension_numbers<[1], [0], [0], [1], [0, 0, 1, 1], [], []>} : vector<64x4xf32>, vector<4x512xf32>, vector<64x512xf32> -> vector<64x512xf32>
    %c0_5 = arith.constant 0 : index
    %c0_6 = arith.constant 0 : index
    %7 = vector.load %arg7[%c0_5, %c0_6] : memref<1x512xf32, #tpu.memory_space<vmem>>, vector<1x512xf32>
    %8 = vector.broadcast %7 : vector<1x512xf32> to vector<64x512xf32>
    %9 = arith.addf %6, %8 : vector<64x512xf32>
    %10 = vector.shape_cast %9 : vector<64x512xf32> to vector<8x8x512xf32>
    %c0_7 = arith.constant 0 : index
    %c0_8 = arith.constant 0 : index
    %11 = vector.load %arg6[%c0_7, %c0_8] : memref<128x512xf32, #tpu.memory_space<vmem>>, vector<128x512xf32>
    %c0_9 = arith.constant 0 : index
    %c0_10 = arith.constant 0 : index
    %12 = vector.load %arg10[%c0_9, %c0_10] : memref<8x128xf32, #tpu.memory_space<vmem>>, vector<8x128xf32>
    %c0_11 = arith.constant 0 : index
    %c0_12 = arith.constant 0 : index
    %13 = vector.load %arg11[%c0_11, %c0_12] : memref<8x128xf32, #tpu.memory_space<vmem>>, vector<8x128xf32>
    %14 = vector.extract_strided_slice %10 {offsets = [0, 0, 0], sizes = [1, 8, 512], strides = [1, 1, 1]} : vector<8x8x512xf32> to vector<1x8x512xf32>
    %15 = vector.shape_cast %14 : vector<1x8x512xf32> to vector<8x512xf32>
    %cst_13 = arith.constant dense<0.000000e+00> : vector<8x512xf32>
    %16 = tpu.matmul %12, %11, %cst_13 {dimension_numbers = #tpu.dot_dimension_numbers<[1], [0], [0], [1], [0, 0, 1, 1], [], []>} : vector<8x128xf32>, vector<128x512xf32>, vector<8x512xf32> -> vector<8x512xf32>
    %17 = arith.addf %15, %16 : vector<8x512xf32>
    %18 = vector.extract_strided_slice %17 {offsets = [0, 0], sizes = [8, 128], strides = [1, 1]} : vector<8x512xf32> to vector<8x128xf32>
    %19 = arith.negf %18 : vector<8x128xf32>
    %20 = math.exp %19 : vector<8x128xf32>
    %cst_14 = arith.constant 1.000000e+00 : f32
    %21 = vector.broadcast %cst_14 : f32 to vector<8x128xf32>
    %22 = arith.addf %21, %20 : vector<8x128xf32>
    %23 = arith.divf %21, %22 : vector<8x128xf32>
    %24 = vector.extract_strided_slice %17 {offsets = [0, 128], sizes = [8, 128], strides = [1, 1]} : vector<8x512xf32> to vector<8x128xf32>
    %25 = arith.negf %24 : vector<8x128xf32>
    %26 = math.exp %25 : vector<8x128xf32>
    %cst_15 = arith.constant 1.000000e+00 : f32
    %27 = vector.broadcast %cst_15 : f32 to vector<8x128xf32>
    %28 = arith.addf %27, %26 : vector<8x128xf32>
    %29 = arith.divf %27, %28 : vector<8x128xf32>
    %30 = vector.extract_strided_slice %17 {offsets = [0, 256], sizes = [8, 128], strides = [1, 1]} : vector<8x512xf32> to vector<8x128xf32>
    %31 = arith.negf %30 : vector<8x128xf32>
    %32 = math.exp %31 : vector<8x128xf32>
    %cst_16 = arith.constant 1.000000e+00 : f32
    %33 = vector.broadcast %cst_16 : f32 to vector<8x128xf32>
    %34 = arith.addf %33, %32 : vector<8x128xf32>
    %35 = arith.divf %33, %34 : vector<8x128xf32>
    %36 = vector.extract_strided_slice %17 {offsets = [0, 384], sizes = [8, 128], strides = [1, 1]} : vector<8x512xf32> to vector<8x128xf32>
    %37 = math.tanh %36 : vector<8x128xf32>
    %38 = arith.mulf %29, %13 : vector<8x128xf32>
    %39 = arith.mulf %23, %37 : vector<8x128xf32>
    %40 = arith.addf %38, %39 : vector<8x128xf32>
    %41 = math.tanh %40 : vector<8x128xf32>
    %42 = arith.mulf %35, %41 : vector<8x128xf32>
    %43 = vector.extract_strided_slice %10 {offsets = [1, 0, 0], sizes = [1, 8, 512], strides = [1, 1, 1]} : vector<8x8x512xf32> to vector<1x8x512xf32>
    %44 = vector.shape_cast %43 : vector<1x8x512xf32> to vector<8x512xf32>
    %cst_17 = arith.constant dense<0.000000e+00> : vector<8x512xf32>
    %45 = tpu.matmul %42, %11, %cst_17 {dimension_numbers = #tpu.dot_dimension_numbers<[1], [0], [0], [1], [0, 0, 1, 1], [], []>} : vector<8x128xf32>, vector<128x512xf32>, vector<8x512xf32> -> vector<8x512xf32>
    %46 = arith.addf %44, %45 : vector<8x512xf32>
    %47 = vector.extract_strided_slice %46 {offsets = [0, 0], sizes = [8, 128], strides = [1, 1]} : vector<8x512xf32> to vector<8x128xf32>
    %48 = arith.negf %47 : vector<8x128xf32>
    %49 = math.exp %48 : vector<8x128xf32>
    %cst_18 = arith.constant 1.000000e+00 : f32
    %50 = vector.broadcast %cst_18 : f32 to vector<8x128xf32>
    %51 = arith.addf %50, %49 : vector<8x128xf32>
    %52 = arith.divf %50, %51 : vector<8x128xf32>
    %53 = vector.extract_strided_slice %46 {offsets = [0, 128], sizes = [8, 128], strides = [1, 1]} : vector<8x512xf32> to vector<8x128xf32>
    %54 = arith.negf %53 : vector<8x128xf32>
    %55 = math.exp %54 : vector<8x128xf32>
    %cst_19 = arith.constant 1.000000e+00 : f32
    %56 = vector.broadcast %cst_19 : f32 to vector<8x128xf32>
    %57 = arith.addf %56, %55 : vector<8x128xf32>
    %58 = arith.divf %56, %57 : vector<8x128xf32>
    %59 = vector.extract_strided_slice %46 {offsets = [0, 256], sizes = [8, 128], strides = [1, 1]} : vector<8x512xf32> to vector<8x128xf32>
    %60 = arith.negf %59 : vector<8x128xf32>
    %61 = math.exp %60 : vector<8x128xf32>
    %cst_20 = arith.constant 1.000000e+00 : f32
    %62 = vector.broadcast %cst_20 : f32 to vector<8x128xf32>
    %63 = arith.addf %62, %61 : vector<8x128xf32>
    %64 = arith.divf %62, %63 : vector<8x128xf32>
    %65 = vector.extract_strided_slice %46 {offsets = [0, 384], sizes = [8, 128], strides = [1, 1]} : vector<8x512xf32> to vector<8x128xf32>
    %66 = math.tanh %65 : vector<8x128xf32>
    %67 = arith.mulf %58, %40 : vector<8x128xf32>
    %68 = arith.mulf %52, %66 : vector<8x128xf32>
    %69 = arith.addf %67, %68 : vector<8x128xf32>
    %70 = math.tanh %69 : vector<8x128xf32>
    %71 = arith.mulf %64, %70 : vector<8x128xf32>
    %72 = vector.extract_strided_slice %10 {offsets = [2, 0, 0], sizes = [1, 8, 512], strides = [1, 1, 1]} : vector<8x8x512xf32> to vector<1x8x512xf32>
    %73 = vector.shape_cast %72 : vector<1x8x512xf32> to vector<8x512xf32>
    %cst_21 = arith.constant dense<0.000000e+00> : vector<8x512xf32>
    %74 = tpu.matmul %71, %11, %cst_21 {dimension_numbers = #tpu.dot_dimension_numbers<[1], [0], [0], [1], [0, 0, 1, 1], [], []>} : vector<8x128xf32>, vector<128x512xf32>, vector<8x512xf32> -> vector<8x512xf32>
    %75 = arith.addf %73, %74 : vector<8x512xf32>
    %76 = vector.extract_strided_slice %75 {offsets = [0, 0], sizes = [8, 128], strides = [1, 1]} : vector<8x512xf32> to vector<8x128xf32>
    %77 = arith.negf %76 : vector<8x128xf32>
    %78 = math.exp %77 : vector<8x128xf32>
    %cst_22 = arith.constant 1.000000e+00 : f32
    %79 = vector.broadcast %cst_22 : f32 to vector<8x128xf32>
    %80 = arith.addf %79, %78 : vector<8x128xf32>
    %81 = arith.divf %79, %80 : vector<8x128xf32>
    %82 = vector.extract_strided_slice %75 {offsets = [0, 128], sizes = [8, 128], strides = [1, 1]} : vector<8x512xf32> to vector<8x128xf32>
    %83 = arith.negf %82 : vector<8x128xf32>
    %84 = math.exp %83 : vector<8x128xf32>
    %cst_23 = arith.constant 1.000000e+00 : f32
    %85 = vector.broadcast %cst_23 : f32 to vector<8x128xf32>
    %86 = arith.addf %85, %84 : vector<8x128xf32>
    %87 = arith.divf %85, %86 : vector<8x128xf32>
    %88 = vector.extract_strided_slice %75 {offsets = [0, 256], sizes = [8, 128], strides = [1, 1]} : vector<8x512xf32> to vector<8x128xf32>
    %89 = arith.negf %88 : vector<8x128xf32>
    %90 = math.exp %89 : vector<8x128xf32>
    %cst_24 = arith.constant 1.000000e+00 : f32
    %91 = vector.broadcast %cst_24 : f32 to vector<8x128xf32>
    %92 = arith.addf %91, %90 : vector<8x128xf32>
    %93 = arith.divf %91, %92 : vector<8x128xf32>
    %94 = vector.extract_strided_slice %75 {offsets = [0, 384], sizes = [8, 128], strides = [1, 1]} : vector<8x512xf32> to vector<8x128xf32>
    %95 = math.tanh %94 : vector<8x128xf32>
    %96 = arith.mulf %87, %69 : vector<8x128xf32>
    %97 = arith.mulf %81, %95 : vector<8x128xf32>
    %98 = arith.addf %96, %97 : vector<8x128xf32>
    %99 = math.tanh %98 : vector<8x128xf32>
    %100 = arith.mulf %93, %99 : vector<8x128xf32>
    %101 = vector.extract_strided_slice %10 {offsets = [3, 0, 0], sizes = [1, 8, 512], strides = [1, 1, 1]} : vector<8x8x512xf32> to vector<1x8x512xf32>
    %102 = vector.shape_cast %101 : vector<1x8x512xf32> to vector<8x512xf32>
    %cst_25 = arith.constant dense<0.000000e+00> : vector<8x512xf32>
    %103 = tpu.matmul %100, %11, %cst_25 {dimension_numbers = #tpu.dot_dimension_numbers<[1], [0], [0], [1], [0, 0, 1, 1], [], []>} : vector<8x128xf32>, vector<128x512xf32>, vector<8x512xf32> -> vector<8x512xf32>
    %104 = arith.addf %102, %103 : vector<8x512xf32>
    %105 = vector.extract_strided_slice %104 {offsets = [0, 0], sizes = [8, 128], strides = [1, 1]} : vector<8x512xf32> to vector<8x128xf32>
    %106 = arith.negf %105 : vector<8x128xf32>
    %107 = math.exp %106 : vector<8x128xf32>
    %cst_26 = arith.constant 1.000000e+00 : f32
    %108 = vector.broadcast %cst_26 : f32 to vector<8x128xf32>
    %109 = arith.addf %108, %107 : vector<8x128xf32>
    %110 = arith.divf %108, %109 : vector<8x128xf32>
    %111 = vector.extract_strided_slice %104 {offsets = [0, 128], sizes = [8, 128], strides = [1, 1]} : vector<8x512xf32> to vector<8x128xf32>
    %112 = arith.negf %111 : vector<8x128xf32>
    %113 = math.exp %112 : vector<8x128xf32>
    %cst_27 = arith.constant 1.000000e+00 : f32
    %114 = vector.broadcast %cst_27 : f32 to vector<8x128xf32>
    %115 = arith.addf %114, %113 : vector<8x128xf32>
    %116 = arith.divf %114, %115 : vector<8x128xf32>
    %117 = vector.extract_strided_slice %104 {offsets = [0, 256], sizes = [8, 128], strides = [1, 1]} : vector<8x512xf32> to vector<8x128xf32>
    %118 = arith.negf %117 : vector<8x128xf32>
    %119 = math.exp %118 : vector<8x128xf32>
    %cst_28 = arith.constant 1.000000e+00 : f32
    %120 = vector.broadcast %cst_28 : f32 to vector<8x128xf32>
    %121 = arith.addf %120, %119 : vector<8x128xf32>
    %122 = arith.divf %120, %121 : vector<8x128xf32>
    %123 = vector.extract_strided_slice %104 {offsets = [0, 384], sizes = [8, 128], strides = [1, 1]} : vector<8x512xf32> to vector<8x128xf32>
    %124 = math.tanh %123 : vector<8x128xf32>
    %125 = arith.mulf %116, %98 : vector<8x128xf32>
    %126 = arith.mulf %110, %124 : vector<8x128xf32>
    %127 = arith.addf %125, %126 : vector<8x128xf32>
    %128 = math.tanh %127 : vector<8x128xf32>
    %129 = arith.mulf %122, %128 : vector<8x128xf32>
    %130 = vector.extract_strided_slice %10 {offsets = [4, 0, 0], sizes = [1, 8, 512], strides = [1, 1, 1]} : vector<8x8x512xf32> to vector<1x8x512xf32>
    %131 = vector.shape_cast %130 : vector<1x8x512xf32> to vector<8x512xf32>
    %cst_29 = arith.constant dense<0.000000e+00> : vector<8x512xf32>
    %132 = tpu.matmul %129, %11, %cst_29 {dimension_numbers = #tpu.dot_dimension_numbers<[1], [0], [0], [1], [0, 0, 1, 1], [], []>} : vector<8x128xf32>, vector<128x512xf32>, vector<8x512xf32> -> vector<8x512xf32>
    %133 = arith.addf %131, %132 : vector<8x512xf32>
    %134 = vector.extract_strided_slice %133 {offsets = [0, 0], sizes = [8, 128], strides = [1, 1]} : vector<8x512xf32> to vector<8x128xf32>
    %135 = arith.negf %134 : vector<8x128xf32>
    %136 = math.exp %135 : vector<8x128xf32>
    %cst_30 = arith.constant 1.000000e+00 : f32
    %137 = vector.broadcast %cst_30 : f32 to vector<8x128xf32>
    %138 = arith.addf %137, %136 : vector<8x128xf32>
    %139 = arith.divf %137, %138 : vector<8x128xf32>
    %140 = vector.extract_strided_slice %133 {offsets = [0, 128], sizes = [8, 128], strides = [1, 1]} : vector<8x512xf32> to vector<8x128xf32>
    %141 = arith.negf %140 : vector<8x128xf32>
    %142 = math.exp %141 : vector<8x128xf32>
    %cst_31 = arith.constant 1.000000e+00 : f32
    %143 = vector.broadcast %cst_31 : f32 to vector<8x128xf32>
    %144 = arith.addf %143, %142 : vector<8x128xf32>
    %145 = arith.divf %143, %144 : vector<8x128xf32>
    %146 = vector.extract_strided_slice %133 {offsets = [0, 256], sizes = [8, 128], strides = [1, 1]} : vector<8x512xf32> to vector<8x128xf32>
    %147 = arith.negf %146 : vector<8x128xf32>
    %148 = math.exp %147 : vector<8x128xf32>
    %cst_32 = arith.constant 1.000000e+00 : f32
    %149 = vector.broadcast %cst_32 : f32 to vector<8x128xf32>
    %150 = arith.addf %149, %148 : vector<8x128xf32>
    %151 = arith.divf %149, %150 : vector<8x128xf32>
    %152 = vector.extract_strided_slice %133 {offsets = [0, 384], sizes = [8, 128], strides = [1, 1]} : vector<8x512xf32> to vector<8x128xf32>
    %153 = math.tanh %152 : vector<8x128xf32>
    %154 = arith.mulf %145, %127 : vector<8x128xf32>
    %155 = arith.mulf %139, %153 : vector<8x128xf32>
    %156 = arith.addf %154, %155 : vector<8x128xf32>
    %157 = math.tanh %156 : vector<8x128xf32>
    %158 = arith.mulf %151, %157 : vector<8x128xf32>
    %159 = vector.extract_strided_slice %10 {offsets = [5, 0, 0], sizes = [1, 8, 512], strides = [1, 1, 1]} : vector<8x8x512xf32> to vector<1x8x512xf32>
    %160 = vector.shape_cast %159 : vector<1x8x512xf32> to vector<8x512xf32>
    %cst_33 = arith.constant dense<0.000000e+00> : vector<8x512xf32>
    %161 = tpu.matmul %158, %11, %cst_33 {dimension_numbers = #tpu.dot_dimension_numbers<[1], [0], [0], [1], [0, 0, 1, 1], [], []>} : vector<8x128xf32>, vector<128x512xf32>, vector<8x512xf32> -> vector<8x512xf32>
    %162 = arith.addf %160, %161 : vector<8x512xf32>
    %163 = vector.extract_strided_slice %162 {offsets = [0, 0], sizes = [8, 128], strides = [1, 1]} : vector<8x512xf32> to vector<8x128xf32>
    %164 = arith.negf %163 : vector<8x128xf32>
    %165 = math.exp %164 : vector<8x128xf32>
    %cst_34 = arith.constant 1.000000e+00 : f32
    %166 = vector.broadcast %cst_34 : f32 to vector<8x128xf32>
    %167 = arith.addf %166, %165 : vector<8x128xf32>
    %168 = arith.divf %166, %167 : vector<8x128xf32>
    %169 = vector.extract_strided_slice %162 {offsets = [0, 128], sizes = [8, 128], strides = [1, 1]} : vector<8x512xf32> to vector<8x128xf32>
    %170 = arith.negf %169 : vector<8x128xf32>
    %171 = math.exp %170 : vector<8x128xf32>
    %cst_35 = arith.constant 1.000000e+00 : f32
    %172 = vector.broadcast %cst_35 : f32 to vector<8x128xf32>
    %173 = arith.addf %172, %171 : vector<8x128xf32>
    %174 = arith.divf %172, %173 : vector<8x128xf32>
    %175 = vector.extract_strided_slice %162 {offsets = [0, 256], sizes = [8, 128], strides = [1, 1]} : vector<8x512xf32> to vector<8x128xf32>
    %176 = arith.negf %175 : vector<8x128xf32>
    %177 = math.exp %176 : vector<8x128xf32>
    %cst_36 = arith.constant 1.000000e+00 : f32
    %178 = vector.broadcast %cst_36 : f32 to vector<8x128xf32>
    %179 = arith.addf %178, %177 : vector<8x128xf32>
    %180 = arith.divf %178, %179 : vector<8x128xf32>
    %181 = vector.extract_strided_slice %162 {offsets = [0, 384], sizes = [8, 128], strides = [1, 1]} : vector<8x512xf32> to vector<8x128xf32>
    %182 = math.tanh %181 : vector<8x128xf32>
    %183 = arith.mulf %174, %156 : vector<8x128xf32>
    %184 = arith.mulf %168, %182 : vector<8x128xf32>
    %185 = arith.addf %183, %184 : vector<8x128xf32>
    %186 = math.tanh %185 : vector<8x128xf32>
    %187 = arith.mulf %180, %186 : vector<8x128xf32>
    %188 = vector.extract_strided_slice %10 {offsets = [6, 0, 0], sizes = [1, 8, 512], strides = [1, 1, 1]} : vector<8x8x512xf32> to vector<1x8x512xf32>
    %189 = vector.shape_cast %188 : vector<1x8x512xf32> to vector<8x512xf32>
    %cst_37 = arith.constant dense<0.000000e+00> : vector<8x512xf32>
    %190 = tpu.matmul %187, %11, %cst_37 {dimension_numbers = #tpu.dot_dimension_numbers<[1], [0], [0], [1], [0, 0, 1, 1], [], []>} : vector<8x128xf32>, vector<128x512xf32>, vector<8x512xf32> -> vector<8x512xf32>
    %191 = arith.addf %189, %190 : vector<8x512xf32>
    %192 = vector.extract_strided_slice %191 {offsets = [0, 0], sizes = [8, 128], strides = [1, 1]} : vector<8x512xf32> to vector<8x128xf32>
    %193 = arith.negf %192 : vector<8x128xf32>
    %194 = math.exp %193 : vector<8x128xf32>
    %cst_38 = arith.constant 1.000000e+00 : f32
    %195 = vector.broadcast %cst_38 : f32 to vector<8x128xf32>
    %196 = arith.addf %195, %194 : vector<8x128xf32>
    %197 = arith.divf %195, %196 : vector<8x128xf32>
    %198 = vector.extract_strided_slice %191 {offsets = [0, 128], sizes = [8, 128], strides = [1, 1]} : vector<8x512xf32> to vector<8x128xf32>
    %199 = arith.negf %198 : vector<8x128xf32>
    %200 = math.exp %199 : vector<8x128xf32>
    %cst_39 = arith.constant 1.000000e+00 : f32
    %201 = vector.broadcast %cst_39 : f32 to vector<8x128xf32>
    %202 = arith.addf %201, %200 : vector<8x128xf32>
    %203 = arith.divf %201, %202 : vector<8x128xf32>
    %204 = vector.extract_strided_slice %191 {offsets = [0, 256], sizes = [8, 128], strides = [1, 1]} : vector<8x512xf32> to vector<8x128xf32>
    %205 = arith.negf %204 : vector<8x128xf32>
    %206 = math.exp %205 : vector<8x128xf32>
    %cst_40 = arith.constant 1.000000e+00 : f32
    %207 = vector.broadcast %cst_40 : f32 to vector<8x128xf32>
    %208 = arith.addf %207, %206 : vector<8x128xf32>
    %209 = arith.divf %207, %208 : vector<8x128xf32>
    %210 = vector.extract_strided_slice %191 {offsets = [0, 384], sizes = [8, 128], strides = [1, 1]} : vector<8x512xf32> to vector<8x128xf32>
    %211 = math.tanh %210 : vector<8x128xf32>
    %212 = arith.mulf %203, %185 : vector<8x128xf32>
    %213 = arith.mulf %197, %211 : vector<8x128xf32>
    %214 = arith.addf %212, %213 : vector<8x128xf32>
    %215 = math.tanh %214 : vector<8x128xf32>
    %216 = arith.mulf %209, %215 : vector<8x128xf32>
    %217 = vector.extract_strided_slice %10 {offsets = [7, 0, 0], sizes = [1, 8, 512], strides = [1, 1, 1]} : vector<8x8x512xf32> to vector<1x8x512xf32>
    %218 = vector.shape_cast %217 : vector<1x8x512xf32> to vector<8x512xf32>
    %cst_41 = arith.constant dense<0.000000e+00> : vector<8x512xf32>
    %219 = tpu.matmul %216, %11, %cst_41 {dimension_numbers = #tpu.dot_dimension_numbers<[1], [0], [0], [1], [0, 0, 1, 1], [], []>} : vector<8x128xf32>, vector<128x512xf32>, vector<8x512xf32> -> vector<8x512xf32>
    %220 = arith.addf %218, %219 : vector<8x512xf32>
    %221 = vector.extract_strided_slice %220 {offsets = [0, 0], sizes = [8, 128], strides = [1, 1]} : vector<8x512xf32> to vector<8x128xf32>
    %222 = arith.negf %221 : vector<8x128xf32>
    %223 = math.exp %222 : vector<8x128xf32>
    %cst_42 = arith.constant 1.000000e+00 : f32
    %224 = vector.broadcast %cst_42 : f32 to vector<8x128xf32>
    %225 = arith.addf %224, %223 : vector<8x128xf32>
    %226 = arith.divf %224, %225 : vector<8x128xf32>
    %227 = vector.extract_strided_slice %220 {offsets = [0, 128], sizes = [8, 128], strides = [1, 1]} : vector<8x512xf32> to vector<8x128xf32>
    %228 = arith.negf %227 : vector<8x128xf32>
    %229 = math.exp %228 : vector<8x128xf32>
    %cst_43 = arith.constant 1.000000e+00 : f32
    %230 = vector.broadcast %cst_43 : f32 to vector<8x128xf32>
    %231 = arith.addf %230, %229 : vector<8x128xf32>
    %232 = arith.divf %230, %231 : vector<8x128xf32>
    %233 = vector.extract_strided_slice %220 {offsets = [0, 256], sizes = [8, 128], strides = [1, 1]} : vector<8x512xf32> to vector<8x128xf32>
    %234 = arith.negf %233 : vector<8x128xf32>
    %235 = math.exp %234 : vector<8x128xf32>
    %cst_44 = arith.constant 1.000000e+00 : f32
    %236 = vector.broadcast %cst_44 : f32 to vector<8x128xf32>
    %237 = arith.addf %236, %235 : vector<8x128xf32>
    %238 = arith.divf %236, %237 : vector<8x128xf32>
    %239 = vector.extract_strided_slice %220 {offsets = [0, 384], sizes = [8, 128], strides = [1, 1]} : vector<8x512xf32> to vector<8x128xf32>
    %240 = math.tanh %239 : vector<8x128xf32>
    %241 = arith.mulf %232, %214 : vector<8x128xf32>
    %242 = arith.mulf %226, %240 : vector<8x128xf32>
    %243 = arith.addf %241, %242 : vector<8x128xf32>
    %244 = math.tanh %243 : vector<8x128xf32>
    %245 = arith.mulf %238, %244 : vector<8x128xf32>
    %c0_45 = arith.constant 0 : index
    %c0_46 = arith.constant 0 : index
    %246 = vector.load %arg10[%c0_45, %c0_46] : memref<8x128xf32, #tpu.memory_space<vmem>>, vector<8x128xf32>
    tpu.vector_store %arg10[%c0_45, %c0_46], %245 {strides = array<i32>} : memref<8x128xf32, #tpu.memory_space<vmem>>, vector<8x128xf32>,
    %c0_47 = arith.constant 0 : index
    %c0_48 = arith.constant 0 : index
    %247 = vector.load %arg11[%c0_47, %c0_48] : memref<8x128xf32, #tpu.memory_space<vmem>>, vector<8x128xf32>
    tpu.vector_store %arg11[%c0_47, %c0_48], %243 {strides = array<i32>} : memref<8x128xf32, #tpu.memory_space<vmem>>, vector<8x128xf32>,
    %248 = vector.shape_cast %42 : vector<8x128xf32> to vector<1x8x128xf32>
    %249 = vector.shape_cast %71 : vector<8x128xf32> to vector<1x8x128xf32>
    %250 = vector.shape_cast %100 : vector<8x128xf32> to vector<1x8x128xf32>
    %251 = vector.shape_cast %129 : vector<8x128xf32> to vector<1x8x128xf32>
    %252 = vector.shape_cast %158 : vector<8x128xf32> to vector<1x8x128xf32>
    %253 = vector.shape_cast %187 : vector<8x128xf32> to vector<1x8x128xf32>
    %254 = vector.shape_cast %216 : vector<8x128xf32> to vector<1x8x128xf32>
    %255 = vector.shape_cast %245 : vector<8x128xf32> to vector<1x8x128xf32>
    %256 = tpu.concatenate %248, %249, %250, %251, %252, %253, %254, %255 in 0 : vector<1x8x128xf32>, vector<1x8x128xf32>, vector<1x8x128xf32>, vector<1x8x128xf32>, vector<1x8x128xf32>, vector<1x8x128xf32>, vector<1x8x128xf32>, vector<1x8x128xf32> -> vector<8x8x128xf32>
    %c0_49 = arith.constant 0 : index
    %c0_50 = arith.constant 0 : index
    %c0_51 = arith.constant 0 : index
    %257 = vector.load %arg8[%c0_49, %c0_50, %c0_51] : memref<8x8x128xf32, #tpu.memory_space<vmem>>, vector<8x8x128xf32>
    tpu.vector_store %arg8[%c0_49, %c0_50, %c0_51], %256 {strides = array<i32>} : memref<8x8x128xf32, #tpu.memory_space<vmem>>, vector<8x8x128xf32>,
    %c0_i32_52 = arith.constant 0 : i32
    %258 = arith.cmpi eq, %arg1, %c0_i32_52 : i32
    %259 = arith.extui %258 : i1 to i32
    %c0_i32_53 = arith.constant 0 : i32
    %260 = arith.cmpi ne, %259, %c0_i32_53 : i32
    scf.if %260 {
      %c0_54 = arith.constant 0 : index
      %c0_55 = arith.constant 0 : index
      %261 = vector.load %arg9[%c0_54, %c0_55] : memref<8x128xf32, #tpu.memory_space<vmem>>, vector<8x128xf32>
      tpu.vector_store %arg9[%c0_54, %c0_55], %243 {strides = array<i32>} : memref<8x128xf32, #tpu.memory_space<vmem>>, vector<8x128xf32>,
    } else {
    }
    return
  }
  func.func @transform_0(%arg0: i32, %arg1: i32) -> (i32, i32, i32) {
    %c0_i32 = arith.constant 0 : i32
    %c0_i32_0 = arith.constant 0 : i32
    return %arg1, %arg0, %c0_i32 : i32, i32, i32
  }
  func.func @transform_1(%arg0: i32, %arg1: i32) -> (i32, i32) {
    %c0_i32 = arith.constant 0 : i32
    %c0_i32_0 = arith.constant 0 : i32
    return %arg0, %c0_i32 : i32, i32
  }
  func.func @transform_2(%arg0: i32, %arg1: i32) -> (i32, i32) {
    %c0_i32 = arith.constant 0 : i32
    %c0_i32_0 = arith.constant 0 : i32
    return %arg0, %c0_i32 : i32, i32
  }
  func.func @transform_3(%arg0: i32, %arg1: i32) -> (i32, i32) {
    %c0_i32 = arith.constant 0 : i32
    %c0_i32_0 = arith.constant 0 : i32
    %c0_i32_1 = arith.constant 0 : i32
    return %c0_i32, %c0_i32_0 : i32, i32
  }
  func.func @transform_4(%arg0: i32, %arg1: i32) -> (i32, i32) {
    %c0_i32 = arith.constant 0 : i32
    %c0_i32_0 = arith.constant 0 : i32
    %c0_i32_1 = arith.constant 0 : i32
    return %c0_i32, %c0_i32_0 : i32, i32
  }
  func.func @transform_5(%arg0: i32, %arg1: i32) -> (i32, i32) {
    %c0_i32 = arith.constant 0 : i32
    %c0_i32_0 = arith.constant 0 : i32
    %c0_i32_1 = arith.constant 0 : i32
    return %c0_i32, %c0_i32_0 : i32, i32
  }
  func.func @transform_6(%arg0: i32, %arg1: i32) -> (i32, i32, i32) {
    %c0_i32 = arith.constant 0 : i32
    %c0_i32_0 = arith.constant 0 : i32
    return %arg1, %arg0, %c0_i32 : i32, i32, i32
  }
  func.func @transform_7(%arg0: i32, %arg1: i32) -> (i32, i32) {
    %c0_i32 = arith.constant 0 : i32
    %c0_i32_0 = arith.constant 0 : i32
    return %arg0, %c0_i32 : i32, i32
  }
}

</mosaic_0001>

<bundles_post_ra>
// kernel: tpu_custom_call.1
= control target key start
LH: loop header
LB: loop body
LE: loop exit
PB: predicated region body
PF: predicated region fallthrough
CT: control target
= control target key end

     0   :  { %13 = vsyncpa [#allocation5], 0  ;;  %s2939_s0 = inlined_call_operand.vmem [shape: f32[8,8,4], index: 0, kind: input, shape index: {}]   ;;  %s2940_s1 = inlined_call_operand.vmem [shape: f32[8,128], index: 1, kind: input, shape index: {}]   ;;  %s2941_s2 = inlined_call_operand.vmem [shape: f32[8,128], index: 2, kind: input, shape index: {}]   ;;  %s2942_s3 = inlined_call_operand.vmem [shape: f32[4,512], index: 3, kind: input, shape index: {}]   ;;  %s2943_s4 = inlined_call_operand.hbm [shape: f32[128,512], index: 4, kind: input, shape index: {}]   ;;  %s2944_s5 = inlined_call_operand.vmem [shape: f32[1,512], index: 5, kind: input, shape index: {}]   ;;  %s2945_s6 = inlined_call_operand.hbm [shape: f32[8,8,128], index: 6, kind: output, shape index: {0}]   ;;  %s2946_s7 = inlined_call_operand.hbm [shape: f32[8,128], index: 7, kind: output, shape index: {1}]  }
   0x1   :  { %14 = vsyncpa [#allocation6], 0 }
   0x2   :  { %15 = vsyncpa [#allocation9], 0  ;;  %s28_s26 = sshll.u32 %s2943_s4, 4  ;;  %s1906_s27 = smov [#allocation4]   ;;  %s29_s26 = int_to_ptr.hbm [resolvable:$true] %s28_s26 }
   0x3   :  { %s30_s28 = sshll.u32 %s1906_s27, 4  ;;  %s1907_s29 = smov 512   ;;  %s31_s28 = int_to_ptr.vmem [resolvable:$true] %s30_s28 }
   0x4   :  { %s1908_s30 = smov 32  }
   0x5   :  { %36 = dma.hbm_to_vmem [thread:$0]  %s29_s26, 8192, %s31_s28, [#allocation5], %s1907_s29, %s1907_s29, %s1908_s30  }
   0x6   :  { %1900 = dma.done.wait [#allocation5], 8192  }
   0x7   :  { %1901 = vsyncadd [#allocation5], 4294959104  ;;  %v59_v0 = vld [vmem:[%s2942_s3] sm:$0xff]  ;;  %v60_v1 = vld [vmem:[%s2942_s3 + $0x8] sm:$0xff]  ;;  %vm105_vm0 = vcmask 1043456   ;;  %vm80_vm1 = vcmask 31744  }
   0x8   :  { %73 = vst [vmem:[#allocation1] ss:$2 sm:$0xff] %v59_v0  ;;  %v51_v2 = vld [vmem:[%s2939_s0] sm:$0xff]  ;;  %v1965_v7 = vld [vmem:[#allocation4 + $0x1e0] sm:$0xff]  ;;  %v1967_v8 = vld [vmem:[#allocation4 + $0x1e8] sm:$0xff]  ;;  %s1554_s9 = sshll.u32 %s2946_s7, 4  ;;  %s1555_s9 = int_to_ptr.hbm [resolvable:$true] %s1554_s9 }
   0x9   :  { %75 = vst [vmem:[#allocation1 + $0x10] ss:$2 sm:$0xff] %v60_v1  ;;  %v1971_v9 = vld [vmem:[#allocation4 + $0x1f0] sm:$0xff]  ;;  %v1973_v10 = vld [vmem:[#allocation4 + $0x1f8] sm:$0xff]  ;;  %v1977_v11 = vld [vmem:[#allocation4 + $0x1c0] sm:$0xff]  ;;  %s1910_s10 = smov [#allocation7]  }
   0xa   :  { %v1979_v12 = vld [vmem:[#allocation4 + $0x1c8] sm:$0xff]  ;;  %v1983_v13 = vld [vmem:[#allocation4 + $0x1d0] sm:$0xff]  ;;  %v1985_v14 = vld [vmem:[#allocation4 + $0x1d8] sm:$0xff]  ;;  %s1538_s11 = sshll.u32 %s1910_s10, 4  ;;  %s1540_s12 = sshll.u32 %s2945_s6, 4  ;;  %s1539_s11 = int_to_ptr.vmem [resolvable:$true] %s1538_s11  ;;  %s1541_s12 = int_to_ptr.hbm [resolvable:$true] %s1540_s12 }
   0xb   :  { %v1988_v15 = vld [vmem:[#allocation4 + $0x1a0] sm:$0xff]  ;;  %v1990_v16 = vld [vmem:[#allocation4 + $0x1a8] sm:$0xff]  ;;  %v1995_v17 = vld [vmem:[#allocation4 + $0x1b0] sm:$0xff]  ;;  %s1911_s3 = smov 128   ;;  %s1912_s13 = smov 8  }
   0xc   :  { %v1997_v18 = vld [vmem:[#allocation4 + $0x1b8] sm:$0xff]  ;;  %v52_v19 = vld [vmem:[%s2939_s0 + $0x8] sm:$0xff]  ;;  %v2008_v21 = vld [vmem:[#allocation4 + $0x188] sm:$0xff] }
   0xd   :  { %v2006_v20 = vld [vmem:[#allocation4 + $0x180] sm:$0xff]  ;;  %v2014_v22 = vld [vmem:[#allocation4 + $0x190] sm:$0xff]  ;;  %v2016_v23 = vld [vmem:[#allocation4 + $0x198] sm:$0xff] }
   0xe   :  { %v2020_v24 = vld [vmem:[#allocation4 + $0x160] sm:$0xff]  ;;  %v2022_v25 = vld [vmem:[#allocation4 + $0x168] sm:$0xff]  ;;  %v2026_v26 = vld [vmem:[#allocation4 + $0x170] sm:$0xff] }
   0xf   :  { %v76_v3 = vld.sshfl [vmem:[#allocation1] sm:$0xff pattern:$0x75316420]  ;;  %v77_v4 = vld.sshfl [vmem:[#allocation1 + $0x8] sm:$0xff pattern:$0x75316420] }
  0x10   :  { %1569 = vmatpush.msk.msra.mxu0 %vm105_vm0, %v76_v3  ;;  %1578 = vmatpush.msk.msra.mxu1 %vm105_vm0, %v77_v4  ;;  %v78_v5 = vld.sshfl [vmem:[#allocation1 + $0x10] sm:$0xff pattern:$0x75316420]  ;;  %v79_v6 = vld.sshfl [vmem:[#allocation1 + $0x18] sm:$0xff pattern:$0x75316420] }
  0x11   :  { %1587 = vmatpush.msk.msra.mxu2 %vm105_vm0, %v78_v5  ;;  %1596 = vmatpush.msk.msra.mxu3 %vm105_vm0, %v79_v6  ;;  %v2028_v27 = vld [vmem:[#allocation4 + $0x178] sm:$0xff]  ;;  %v2031_v28 = vld [vmem:[#allocation4 + $0x140] sm:$0xff]  ;;  %v2033_v29 = vld [vmem:[#allocation4 + $0x148] sm:$0xff] }
  0x12   :  { %1570 = vmatmul.msk.f32.vlgmr.msra.gmra.mxu0 %vm80_vm1, %v51_v2  ;;  %1579 = vmatmul.msk.f32.vlgmr.msra.gmra.mxu1 %vm80_vm1, %v51_v2  ;;  %v2038_v30 = vld [vmem:[#allocation4 + $0x150] sm:$0xff]  ;;  %v2040_v31 = vld [vmem:[#allocation4 + $0x158] sm:$0xff]  ;;  %v53_v32 = vld [vmem:[%s2939_s0 + $0x10] sm:$0xff] }
  0x13   :  { %1588 = vmatmul.msk.f32.vlgmr.msra.gmra.mxu2 %vm80_vm1, %v51_v2  ;;  %1597 = vmatmul.msk.f32.vlgmr.msra.gmra.mxu3 %vm80_vm1, %v51_v2  ;;  %v2049_v33 = vld [vmem:[#allocation4 + $0x120] sm:$0xff]  ;;  %v2051_v34 = vld [vmem:[#allocation4 + $0x128] sm:$0xff]  ;;  %v2057_v35 = vld [vmem:[#allocation4 + $0x130] sm:$0xff] }
  0x14   :  { %344 = vmatpush.msrb.mxu0 %v1965_v7  ;;  %364 = vmatpush.msrb.mxu1 %v1967_v8  ;;  %v2059_v36 = vld [vmem:[#allocation4 + $0x138] sm:$0xff]  ;;  %v2063_v37 = vld [vmem:[#allocation4 + $0x100] sm:$0xff]  ;;  %v2065_v38 = vld [vmem:[#allocation4 + $0x108] sm:$0xff] }
  0x15   :  { %384 = vmatpush.msrb.mxu2 %v1971_v9  ;;  %404 = vmatpush.msrb.mxu3 %v1973_v10  ;;  %v2069_v39 = vld [vmem:[#allocation4 + $0x110] sm:$0xff]  ;;  %v2071_v40 = vld [vmem:[#allocation4 + $0x118] sm:$0xff]  ;;  %v2074_v41 = vld [vmem:[#allocation4 + $0xe0] sm:$0xff] }
  0x16   :  { %345 = vmatpush.msrb.mxu0 %v1977_v11  ;;  %365 = vmatpush.msrb.mxu1 %v1979_v12  ;;  %v2076_v42 = vld [vmem:[#allocation4 + $0xe8] sm:$0xff]  ;;  %v2081_v43 = vld [vmem:[#allocation4 + $0xf0] sm:$0xff]  ;;  %v2083_v44 = vld [vmem:[#allocation4 + $0xf8] sm:$0xff] }
  0x17   :  { %385 = vmatpush.msrb.mxu2 %v1983_v13  ;;  %405 = vmatpush.msrb.mxu3 %v1985_v14  ;;  %v54_v45 = vld [vmem:[%s2939_s0 + $0x18] sm:$0xff]  ;;  %v2092_v46 = vld [vmem:[#allocation4 + $0xc0] sm:$0xff]  ;;  %v2094_v47 = vld [vmem:[#allocation4 + $0xc8] sm:$0xff] }
  0x18   :  { %346 = vmatpush.msrb.mxu0 %v1988_v15  ;;  %366 = vmatpush.msrb.mxu1 %v1990_v16  ;;  %v2100_v48 = vld [vmem:[#allocation4 + $0xd0] sm:$0xff]  ;;  %v2102_v49 = vld [vmem:[#allocation4 + $0xd8] sm:$0xff]  ;;  %v2106_v50 = vld [vmem:[#allocation4 + $0xa0] sm:$0xff] }
  0x19   :  { %386 = vmatpush.msrb.mxu2 %v1995_v17  ;;  %406 = vmatpush.msrb.mxu3 %v1997_v18  ;;  %3032 = vst [vmem:[#allocation13_spill] sm:$0xff] %v2102_v49  ;;  %v2108_v51 = vld [vmem:[#allocation4 + $0xa8] sm:$0xff]  ;;  %v2112_v52 = vld [vmem:[#allocation4 + $0xb0] sm:$0xff]  ;;  %v2114_v53 = vld [vmem:[#allocation4 + $0xb8] sm:$0xff] }
  0x1a   :  { %1571 = vmatmul.msk.f32.gmra.mxu0 %vm80_vm1, %v52_v19  ;;  %1580 = vmatmul.msk.f32.gmra.mxu1 %vm80_vm1, %v52_v19  ;;  %3033 = vst [vmem:[#allocation14_spill] sm:$0xff] %v2106_v50  ;;  %v2117_v54 = vld [vmem:[#allocation4 + $0x80] sm:$0xff]  ;;  %v2119_v55 = vld [vmem:[#allocation4 + $0x88] sm:$0xff]  ;;  %v2124_v56 = vld [vmem:[#allocation4 + $0x90] sm:$0xff] }
  0x1b   :  { %1589 = vmatmul.msk.f32.gmra.mxu2 %vm80_vm1, %v52_v19  ;;  %1598 = vmatmul.msk.f32.gmra.mxu3 %vm80_vm1, %v52_v19  ;;  %3034 = vst [vmem:[#allocation15_spill] sm:$0xff] %v2108_v51  ;;  %v2126_v57 = vld [vmem:[#allocation4 + $0x98] sm:$0xff]  ;;  %v2135_v59 = vld [vmem:[#allocation4 + $0x60] sm:$0xff]  ;;  %v2137_v60 = vld [vmem:[#allocation4 + $0x68] sm:$0xff] }
  0x1c   :  { %347 = vmatpush.msrb.mxu0 %v2006_v20  ;;  %367 = vmatpush.msrb.mxu1 %v2008_v21  ;;  %3035 = vst [vmem:[#allocation16_spill] sm:$0xff] %v2112_v52  ;;  %v55_v58 = vld [vmem:[%s2939_s0 + $0x20] sm:$0xff]  ;;  %v2143_v61 = vld [vmem:[#allocation4 + $0x70] sm:$0xff]  ;;  %v2149_v63 = vld [vmem:[#allocation4 + $0x40] sm:$0xff] }
  0x1d   :  { %387 = vmatpush.msrb.mxu2 %v2014_v22  ;;  %407 = vmatpush.msrb.mxu3 %v2016_v23  ;;  %3036 = vst [vmem:[#allocation17_spill] sm:$0xff] %v2114_v53  ;;  %v2145_v62 = vld [vmem:[#allocation4 + $0x78] sm:$0xff]  ;;  %v2151_v0 = vld [vmem:[#allocation4 + $0x48] sm:$0xff]  ;;  %v2155_v1 = vld [vmem:[#allocation4 + $0x50] sm:$0xff] }
  0x1e   :  { %348 = vmatpush.msrb.mxu0 %v2020_v24  ;;  %368 = vmatpush.msrb.mxu1 %v2022_v25  ;;  %3037 = vst [vmem:[#allocation18_spill] sm:$0xff] %v2117_v54  ;;  %v2157_v2 = vld [vmem:[#allocation4 + $0x58] sm:$0xff]  ;;  %v2160_v3 = vld [vmem:[#allocation4 + $0x20] sm:$0xff]  ;;  %v2162_v4 = vld [vmem:[#allocation4 + $0x28] sm:$0xff] }
  0x1f   :  { %388 = vmatpush.msrb.mxu2 %v2026_v26  ;;  %408 = vmatpush.msrb.mxu3 %v2028_v27  ;;  %3038 = vst [vmem:[#allocation19_spill] sm:$0xff] %v2119_v55  ;;  %v2167_v5 = vld [vmem:[#allocation4 + $0x30] sm:$0xff]  ;;  %v2169_v6 = vld [vmem:[#allocation4 + $0x38] sm:$0xff]  ;;  %v56_v19 = vld [vmem:[%s2939_s0 + $0x28] sm:$0xff] }
  0x20   :  { %349 = vmatpush.msrb.mxu0 %v2031_v28  ;;  %369 = vmatpush.msrb.mxu1 %v2033_v29  ;;  %3039 = vst [vmem:[#allocation20_spill] sm:$0xff] %v2124_v56 }
  0x21   :  { %389 = vmatpush.msrb.mxu2 %v2038_v30  ;;  %409 = vmatpush.msrb.mxu3 %v2040_v31  ;;  %3040 = vst [vmem:[#allocation21_spill] sm:$0xff] %v2126_v57 }
  0x22   :  { %1572 = vmatmul.msk.f32.gmra.mxu0 %vm80_vm1, %v53_v32  ;;  %1581 = vmatmul.msk.f32.gmra.mxu1 %vm80_vm1, %v53_v32  ;;  %3041 = vst [vmem:[#allocation22_spill] sm:$0xff] %v2135_v59 }
  0x23   :  { %1590 = vmatmul.msk.f32.gmra.mxu2 %vm80_vm1, %v53_v32  ;;  %1599 = vmatmul.msk.f32.gmra.mxu3 %vm80_vm1, %v53_v32  ;;  %3042 = vst [vmem:[#allocation23_spill] sm:$0xff] %v2137_v60  ;;  %v2178_v32 = vld [vmem:[#allocation4] sm:$0xff] }
  0x24   :  { %350 = vmatpush.msrb.mxu0 %v2049_v33  ;;  %370 = vmatpush.msrb.mxu1 %v2051_v34  ;;  %3043 = vst [vmem:[#allocation24_spill] sm:$0xff] %v2143_v61 }
  0x25   :  { %390 = vmatpush.msrb.mxu2 %v2057_v35  ;;  %410 = vmatpush.msrb.mxu3 %v2059_v36  ;;  %3044 = vst [vmem:[#allocation25_spill] sm:$0xff] %v2145_v62 }
  0x26   :  { %351 = vmatpush.msrb.mxu0 %v2063_v37  ;;  %371 = vmatpush.msrb.mxu1 %v2065_v38  ;;  %3045 = vst [vmem:[#allocation26_spill] sm:$0xff] %v2149_v63 }
  0x27   :  { %391 = vmatpush.msrb.mxu2 %v2069_v39  ;;  %411 = vmatpush.msrb.mxu3 %v2071_v40  ;;  %3046 = vst [vmem:[#allocation27_spill] sm:$0xff] %v2151_v0 }
  0x28   :  { %352 = vmatpush.msrb.mxu0 %v2074_v41  ;;  %372 = vmatpush.msrb.mxu1 %v2076_v42  ;;  %3047 = vst [vmem:[#allocation28_spill] sm:$0xff] %v2155_v1 }
  0x29   :  { %392 = vmatpush.msrb.mxu2 %v2081_v43  ;;  %412 = vmatpush.msrb.mxu3 %v2083_v44  ;;  %3048 = vst [vmem:[#allocation29_spill] sm:$0xff] %v2157_v2 }
  0x2a   :  { %1573 = vmatmul.msk.f32.gmra.mxu0 %vm80_vm1, %v54_v45  ;;  %1582 = vmatmul.msk.f32.gmra.mxu1 %vm80_vm1, %v54_v45  ;;  %3049 = vst [vmem:[#allocation30_spill] sm:$0xff] %v2160_v3 }
  0x2b   :  { %1591 = vmatmul.msk.f32.gmra.mxu2 %vm80_vm1, %v54_v45  ;;  %1600 = vmatmul.msk.f32.gmra.mxu3 %vm80_vm1, %v54_v45  ;;  %3050 = vst [vmem:[#allocation31_spill] sm:$0xff] %v2162_v4  ;;  %v2180_v45 = vld [vmem:[#allocation4 + $0x8] sm:$0xff] }
  0x2c   :  { %353 = vmatpush.msrb.mxu0 %v2092_v46  ;;  %373 = vmatpush.msrb.mxu1 %v2094_v47  ;;  %3051 = vst [vmem:[#allocation32_spill] sm:$0xff] %v2167_v5 }
  0x2d   :  { %393 = vmatpush.msrb.mxu2 %v2100_v48  ;;  %413 = vmatpush.msrb.mxu3 %v2102_v49  ;;  %3052 = vst [vmem:[#allocation33_spill] sm:$0xff] %v2169_v6 }
  0x2e   :  { %354 = vmatpush.msrb.mxu0 %v2106_v50  ;;  %374 = vmatpush.msrb.mxu1 %v2108_v51  ;;  %3053 = vst [vmem:[#allocation34_spill] sm:$0xff] %v2178_v32 }
  0x2f   :  { %394 = vmatpush.msrb.mxu2 %v2112_v52  ;;  %414 = vmatpush.msrb.mxu3 %v2114_v53  ;;  %3054 = vst [vmem:[#allocation35_spill] sm:$0xff] %v2180_v45 }
  0x30   :  { %355 = vmatpush.msrb.mxu0 %v2117_v54  ;;  %375 = vmatpush.msrb.mxu1 %v2119_v55 }
  0x31   :  { %395 = vmatpush.msrb.mxu2 %v2124_v56  ;;  %415 = vmatpush.msrb.mxu3 %v2126_v57 }
  0x32   :  { %1574 = vmatmul.msk.f32.gmra.mxu0 %vm80_vm1, %v55_v58  ;;  %1583 = vmatmul.msk.f32.gmra.mxu1 %vm80_vm1, %v55_v58 }
  0x33   :  { %1592 = vmatmul.msk.f32.gmra.mxu2 %vm80_vm1, %v55_v58  ;;  %1601 = vmatmul.msk.f32.gmra.mxu3 %vm80_vm1, %v55_v58  ;;  %v2186_v58 = vld [vmem:[#allocation4 + $0x10] sm:$0xff] }
  0x34   :  { %356 = vmatpush.msrb.mxu0 %v2135_v59  ;;  %376 = vmatpush.msrb.mxu1 %v2137_v60  ;;  %3055 = vst [vmem:[#allocation36_spill] sm:$0xff] %v2186_v58 }
  0x35   :  { %396 = vmatpush.msrb.mxu2 %v2143_v61  ;;  %416 = vmatpush.msrb.mxu3 %v2145_v62 }
  0x36   :  { %357 = vmatpush.msrb.mxu0 %v2149_v63  ;;  %377 = vmatpush.msrb.mxu1 %v2151_v0 }
  0x37   :  { %397 = vmatpush.msrb.mxu2 %v2155_v1  ;;  %417 = vmatpush.msrb.mxu3 %v2157_v2  ;;  %v2188_v1 = vld [vmem:[#allocation4 + $0x18] sm:$0xff] }
  0x38   :  { %358 = vmatpush.msrb.mxu0 %v2160_v3  ;;  %378 = vmatpush.msrb.mxu1 %v2162_v4  ;;  %3056 = vst [vmem:[#allocation37_spill] sm:$0xff] %v2188_v1 }
  0x39   :  { %398 = vmatpush.msrb.mxu2 %v2167_v5  ;;  %418 = vmatpush.msrb.mxu3 %v2169_v6  ;;  %v57_v6 = vld [vmem:[%s2939_s0 + $0x30] sm:$0xff] }
  0x3a   :  { %1575 = vmatmul.msk.f32.gmra.mxu0 %vm80_vm1, %v56_v19  ;;  %1584 = vmatmul.msk.f32.gmra.mxu1 %vm80_vm1, %v56_v19 }
  0x3b   :  { %1593 = vmatmul.msk.f32.gmra.mxu2 %vm80_vm1, %v56_v19  ;;  %1602 = vmatmul.msk.f32.gmra.mxu3 %vm80_vm1, %v56_v19  ;;  %v58_v19 = vld [vmem:[%s2939_s0 + $0x38] sm:$0xff] }
  0x3c   :  { %359 = vmatpush.msrb.mxu0 %v2178_v32  ;;  %379 = vmatpush.msrb.mxu1 %v2180_v45 }
  0x3d   :  { %399 = vmatpush.msrb.mxu2 %v2186_v58  ;;  %419 = vmatpush.msrb.mxu3 %v2188_v1 }
  0x3e   :  { %491 = vmatpush.msra.mxu0 %v1965_v7  ;;  %511 = vmatpush.msra.mxu1 %v1967_v8 }
  0x3f   :  { %531 = vmatpush.msra.mxu2 %v1971_v9  ;;  %551 = vmatpush.msra.mxu3 %v1973_v10 }
  0x40   :  { %492 = vmatpush.msra.mxu0 %v1977_v11  ;;  %512 = vmatpush.msra.mxu1 %v1979_v12 }
  0x41   :  { %532 = vmatpush.msra.mxu2 %v1983_v13  ;;  %552 = vmatpush.msra.mxu3 %v1985_v14 }
  0x42   :  { %1576 = vmatmul.msk.f32.gmra.mxu0 %vm80_vm1, %v57_v6  ;;  %1585 = vmatmul.msk.f32.gmra.mxu1 %vm80_vm1, %v57_v6 }
  0x43   :  { %1594 = vmatmul.msk.f32.gmra.mxu2 %vm80_vm1, %v57_v6  ;;  %1603 = vmatmul.msk.f32.gmra.mxu3 %vm80_vm1, %v57_v6  ;;  %v47_v6 = vld [vmem:[%s2940_s1] sm:$0xff] }
  0x44   :  { %493 = vmatpush.msra.mxu0 %v1988_v15  ;;  %513 = vmatpush.msra.mxu1 %v1990_v16 }
  0x45   :  { %533 = vmatpush.msra.mxu2 %v1995_v17  ;;  %553 = vmatpush.msra.mxu3 %v1997_v18 }
  0x46   :  { %494 = vmatpush.msra.mxu0 %v2006_v20  ;;  %514 = vmatpush.msra.mxu1 %v2008_v21 }
  0x47   :  { %534 = vmatpush.msra.mxu2 %v2014_v22  ;;  %554 = vmatpush.msra.mxu3 %v2016_v23 }
  0x48   :  { %495 = vmatpush.msra.mxu0 %v2020_v24  ;;  %515 = vmatpush.msra.mxu1 %v2022_v25 }
  0x49   :  { %535 = vmatpush.msra.mxu2 %v2026_v26  ;;  %555 = vmatpush.msra.mxu3 %v2028_v27 }
  0x4a   :  { %1577 = vmatmul.msk.f32.gmra.mxu0 %vm80_vm1, %v58_v19  ;;  %1586 = vmatmul.msk.f32.gmra.mxu1 %vm80_vm1, %v58_v19 }
  0x4b   :  { %1595 = vmatmul.msk.f32.gmra.mxu2 %vm80_vm1, %v58_v19  ;;  %1604 = vmatmul.msk.f32.gmra.mxu3 %vm80_vm1, %v58_v19  ;;  %v3057_v19 = vld [vmem:[#allocation28_spill] sm:$0xff] }
  0x4c   :  { %496 = vmatpush.msra.mxu0 %v2031_v28  ;;  %516 = vmatpush.msra.mxu1 %v2033_v29 }
  0x4d   :  { %536 = vmatpush.msra.mxu2 %v2038_v30  ;;  %556 = vmatpush.msra.mxu3 %v2040_v31 }
  0x4e   :  { %497 = vmatpush.msra.mxu0 %v2049_v33  ;;  %517 = vmatpush.msra.mxu1 %v2051_v34 }
  0x4f   :  { %537 = vmatpush.msra.mxu2 %v2057_v35  ;;  %557 = vmatpush.msra.mxu3 %v2059_v36 }
  0x50   :  { %498 = vmatpush.msra.mxu0 %v2063_v37  ;;  %518 = vmatpush.msra.mxu1 %v2065_v38 }
  0x51   :  { %538 = vmatpush.msra.mxu2 %v2069_v39  ;;  %558 = vmatpush.msra.mxu3 %v2071_v40 }
  0x52   :  { %360 = vmatmul.f32.vlgmr.msrb.gmra.mxu0 %v47_v6  ;;  %380 = vmatmul.f32.vlgmr.msrb.gmra.mxu1 %v47_v6 }
  0x53   :  { %400 = vmatmul.f32.vlgmr.msrb.gmra.mxu2 %v47_v6  ;;  %420 = vmatmul.f32.vlgmr.msrb.gmra.mxu3 %v47_v6  ;;  %v3058_v6 = vld [vmem:[#allocation33_spill] sm:$0xff] }
  0x54   :  { %499 = vmatpush.msra.mxu0 %v2074_v41  ;;  %519 = vmatpush.msra.mxu1 %v2076_v42 }
  0x55   :  { %539 = vmatpush.msra.mxu2 %v2081_v43  ;;  %559 = vmatpush.msra.mxu3 %v2083_v44 }
  0x56   :  { %500 = vmatpush.msra.mxu0 %v2092_v46  ;;  %520 = vmatpush.msra.mxu1 %v2094_v47 }
  0x57   :  { %540 = vmatpush.msra.mxu2 %v2100_v48  ;;  %560 = vmatpush.msra.mxu3 %v2102_v49 }
  0x58   :  { %501 = vmatpush.msra.mxu0 %v2106_v50  ;;  %521 = vmatpush.msra.mxu1 %v2108_v51 }
  0x59   :  { %541 = vmatpush.msra.mxu2 %v2112_v52  ;;  %561 = vmatpush.msra.mxu3 %v2114_v53 }
  0x5a   :  { %502 = vmatpush.msra.mxu0 %v2117_v54  ;;  %522 = vmatpush.msra.mxu1 %v2119_v55 }
  0x5b   :  { %542 = vmatpush.msra.mxu2 %v2124_v56  ;;  %562 = vmatpush.msra.mxu3 %v2126_v57 }
  0x5c   :  { %503 = vmatpush.msra.mxu0 %v2135_v59  ;;  %523 = vmatpush.msra.mxu1 %v2137_v60 }
  0x5d   :  { %543 = vmatpush.msra.mxu2 %v2143_v61  ;;  %563 = vmatpush.msra.mxu3 %v2145_v62 }
  0x5e   :  { %504 = vmatpush.msra.mxu0 %v2149_v63  ;;  %524 = vmatpush.msra.mxu1 %v2151_v0 }
  0x5f   :  { %544 = vmatpush.msra.mxu2 %v3057_v19  ;;  %564 = vmatpush.msra.mxu3 %v2157_v2 }
  0x60   :  { %505 = vmatpush.msra.mxu0 %v2160_v3  ;;  %525 = vmatpush.msra.mxu1 %v2162_v4 }
  0x61   :  { %545 = vmatpush.msra.mxu2 %v2167_v5  ;;  %565 = vmatpush.msra.mxu3 %v3058_v6 }
  0x62   :  { %506 = vmatpush.msra.mxu0 %v2178_v32  ;;  %526 = vmatpush.msra.mxu1 %v2180_v45 }
  0x63   :  { %546 = vmatpush.msra.mxu2 %v2186_v58  ;;  %566 = vmatpush.msra.mxu3 %v2188_v1 }
  0x64   :  { %638 = vmatpush.msrb.mxu0 %v1965_v7  ;;  %658 = vmatpush.msrb.mxu1 %v1967_v8 }
  0x65   :  { %678 = vmatpush.msrb.mxu2 %v1971_v9  ;;  %698 = vmatpush.msrb.mxu3 %v1973_v10 }
  0x66   :  { %639 = vmatpush.msrb.mxu0 %v1977_v11  ;;  %659 = vmatpush.msrb.mxu1 %v1979_v12 }
  0x67   :  { %679 = vmatpush.msrb.mxu2 %v1983_v13  ;;  %699 = vmatpush.msrb.mxu3 %v1985_v14 }
  0x68   :  { %640 = vmatpush.msrb.mxu0 %v1988_v15  ;;  %660 = vmatpush.msrb.mxu1 %v1990_v16 }
  0x69   :  { %680 = vmatpush.msrb.mxu2 %v1995_v17  ;;  %700 = vmatpush.msrb.mxu3 %v1997_v18 }
  0x6a   :  { %641 = vmatpush.msrb.mxu0 %v2006_v20  ;;  %661 = vmatpush.msrb.mxu1 %v2008_v21 }
  0x6b   :  { %681 = vmatpush.msrb.mxu2 %v2014_v22  ;;  %701 = vmatpush.msrb.mxu3 %v2016_v23 }
  0x6c   :  { %642 = vmatpush.msrb.mxu0 %v2020_v24  ;;  %662 = vmatpush.msrb.mxu1 %v2022_v25 }
  0x6d   :  { %682 = vmatpush.msrb.mxu2 %v2026_v26  ;;  %702 = vmatpush.msrb.mxu3 %v2028_v27 }
  0x6e   :  { %643 = vmatpush.msrb.mxu0 %v2031_v28  ;;  %663 = vmatpush.msrb.mxu1 %v2033_v29 }
  0x6f   :  { %683 = vmatpush.msrb.mxu2 %v2038_v30  ;;  %703 = vmatpush.msrb.mxu3 %v2040_v31 }
  0x70   :  { %644 = vmatpush.msrb.mxu0 %v2049_v33  ;;  %664 = vmatpush.msrb.mxu1 %v2051_v34 }
  0x71   :  { %684 = vmatpush.msrb.mxu2 %v2057_v35  ;;  %704 = vmatpush.msrb.mxu3 %v2059_v36 }
  0x72   :  { %645 = vmatpush.msrb.mxu0 %v2063_v37  ;;  %665 = vmatpush.msrb.mxu1 %v2065_v38 }
  0x73   :  { %685 = vmatpush.msrb.mxu2 %v2069_v39  ;;  %705 = vmatpush.msrb.mxu3 %v2071_v40 }
  0x74   :  { %646 = vmatpush.msrb.mxu0 %v2074_v41  ;;  %666 = vmatpush.msrb.mxu1 %v2076_v42 }
  0x75   :  { %686 = vmatpush.msrb.mxu2 %v2081_v43  ;;  %706 = vmatpush.msrb.mxu3 %v2083_v44 }
  0x76   :  { %647 = vmatpush.msrb.mxu0 %v2092_v46  ;;  %667 = vmatpush.msrb.mxu1 %v2094_v47 }
  0x77   :  { %687 = vmatpush.msrb.mxu2 %v2100_v48  ;;  %707 = vmatpush.msrb.mxu3 %v2102_v49 }
  0x78   :  { %648 = vmatpush.msrb.mxu0 %v2106_v50  ;;  %668 = vmatpush.msrb.mxu1 %v2108_v51 }
  0x79   :  { %688 = vmatpush.msrb.mxu2 %v2112_v52  ;;  %708 = vmatpush.msrb.mxu3 %v2114_v53 }
  0x7a   :  { %649 = vmatpush.msrb.mxu0 %v2117_v54  ;;  %669 = vmatpush.msrb.mxu1 %v2119_v55 }
  0x7b   :  { %689 = vmatpush.msrb.mxu2 %v2124_v56  ;;  %709 = vmatpush.msrb.mxu3 %v2126_v57 }
  0x7c   :  { %650 = vmatpush.msrb.mxu0 %v2135_v59  ;;  %670 = vmatpush.msrb.mxu1 %v2137_v60 }
  0x7d   :  { %690 = vmatpush.msrb.mxu2 %v2143_v61  ;;  %710 = vmatpush.msrb.mxu3 %v2145_v62 }
  0x7e   :  { %651 = vmatpush.msrb.mxu0 %v2149_v63  ;;  %671 = vmatpush.msrb.mxu1 %v2151_v0 }
  0x7f   :  { %691 = vmatpush.msrb.mxu2 %v3057_v19  ;;  %711 = vmatpush.msrb.mxu3 %v2157_v2 }
  0x80   :  { %652 = vmatpush.msrb.mxu0 %v2160_v3  ;;  %672 = vmatpush.msrb.mxu1 %v2162_v4  ;;  %v61_v3 = vld [vmem:[%s2944_s5] sm:$0xf] }
  0x81   :  { %692 = vmatpush.msrb.mxu2 %v2167_v5  ;;  %712 = vmatpush.msrb.mxu3 %v3058_v6  ;;  %v63_v2 = vperm.slane %v61_v3, 0  ;;  %v64_v4 = vperm.slane %v61_v3, 1 }
  0x82   :  { %653 = vmatpush.msrb.mxu0 %v2178_v32  ;;  %673 = vmatpush.msrb.mxu1 %v2180_v45 }
  0x83   :  { %693 = vmatpush.msrb.mxu2 %v2186_v58  ;;  %713 = vmatpush.msrb.mxu3 %v2188_v1  ;;  %v2352_v58 = vperm.slane %v61_v3, 2  ;;  %v2354_v1 = vperm.slane %v61_v3, 3 }
  0x8f   :  { %v131_v0 = vpop.f32.mrf.mxu0  ;;  %v172_v19 = vpop.f32.mrf.mxu1 }
  0x96   :  { %v2344_v63 = vpop.f32.mrf.mxu2  ;;  %v2346_v5 = vpop.f32.mrf.mxu3 }
  0x97   :  { %v134_v6 = vpop.f32.mrf.mxu0  ;;  %v175_v32 = vpop.f32.mrf.mxu1 }
  0x98   :  { %v2348_v62 = vadd.f32 %v134_v6, %v63_v2  ;;  %v2350_v45 = vadd.f32 %v175_v32, %v64_v4 }
  0x9a   :  { %3059 = vst [vmem:[#allocation38_spill] sm:$0xff] %v2348_v62 }
  0x9b   :  { %3060 = vst [vmem:[#allocation39_spill] sm:$0xff] %v2350_v45 }
  0x9e   :  { %v216_v61 = vpop.f32.mrf.mxu2  ;;  %v257_v60 = vpop.f32.mrf.mxu3 }
  0x9f   :  { %v2357_v59 = vadd.f32 %v216_v61, %v2352_v58  ;;  %v2360_v57 = vadd.f32 %v257_v60, %v2354_v1  ;;  %v137_v56 = vpop.f32.mrf.mxu0  ;;  %v178_v55 = vpop.f32.mrf.mxu1 }
  0xa0   :  { %v2362_v54 = vadd.f32 %v137_v56, %v63_v2  ;;  %v2364_v6 = vadd.f32 %v178_v55, %v64_v4 }
  0xa1   :  { %3061 = vst [vmem:[#allocation40_spill] sm:$0xff] %v2357_v59 }
  0xa2   :  { %3062 = vst [vmem:[#allocation41_spill] sm:$0xff] %v2360_v57 }
  0xa3   :  { %3063 = vst [vmem:[#allocation42_spill] sm:$0xff] %v2362_v54 }
  0xa4   :  { %3064 = vst [vmem:[#allocation43_spill] sm:$0xff] %v2364_v6 }
  0xa6   :  { %v219_v32 = vpop.f32.mrf.mxu2  ;;  %v260_v45 = vpop.f32.mrf.mxu3 }
  0xa7   :  { %v2367_v62 = vadd.f32 %v219_v32, %v2352_v58  ;;  %v2370_v3 = vadd.f32 %v260_v45, %v2354_v1  ;;  %v140_v53 = vpop.f32.mrf.mxu0  ;;  %v181_v61 = vpop.f32.mrf.mxu1 }
  0xa8   :  { %v2372_v59 = vadd.f32 %v140_v53, %v63_v2  ;;  %v2374_v60 = vadd.f32 %v181_v61, %v64_v4 }
  0xa9   :  { %3065 = vst [vmem:[#allocation44_spill] sm:$0xff] %v2367_v62 }
  0xaa   :  { %3066 = vst [vmem:[#allocation45_spill] sm:$0xff] %v2370_v3 }
  0xab   :  { %3067 = vst [vmem:[#allocation46_spill] sm:$0xff] %v2372_v59 }
  0xac   :  { %3068 = vst [vmem:[#allocation47_spill] sm:$0xff] %v2374_v60 }
  0xae   :  { %v222_v57 = vpop.f32.mrf.mxu2  ;;  %v263_v52 = vpop.f32.mrf.mxu3 }
  0xaf   :  { %v2377_v56 = vadd.f32 %v222_v57, %v2352_v58  ;;  %v2380_v55 = vadd.f32 %v263_v52, %v2354_v1  ;;  %v143_v6 = vpop.f32.mrf.mxu0  ;;  %v184_v32 = vpop.f32.mrf.mxu1 }
  0xb0   :  { %v2382_v62 = vadd.f32 %v143_v6, %v63_v2  ;;  %v2384_v45 = vadd.f32 %v184_v32, %v64_v4 }
  0xb1   :  { %3069 = vst [vmem:[#allocation48_spill] sm:$0xff] %v2377_v56 }
  0xb2   :  { %3070 = vst [vmem:[#allocation49_spill] sm:$0xff] %v2380_v55 }
  0xb3   :  { %3071 = vst [vmem:[#allocation50_spill] sm:$0xff] %v2382_v62 }
  0xb4   :  { %3072 = vst [vmem:[#allocation51_spill] sm:$0xff] %v2384_v45 }
  0xb6   :  { %v225_v3 = vpop.f32.mrf.mxu2  ;;  %v266_v54 = vpop.f32.mrf.mxu3 }
  0xb7   :  { %v2387_v53 = vadd.f32 %v225_v3, %v2352_v58  ;;  %v2390_v61 = vadd.f32 %v266_v54, %v2354_v1  ;;  %v146_v60 = vpop.f32.mrf.mxu0  ;;  %v187_v57 = vpop.f32.mrf.mxu1 }
  0xb8   :  { %v2392_v56 = vadd.f32 %v146_v60, %v63_v2  ;;  %v2394_v52 = vadd.f32 %v187_v57, %v64_v4 }
  0xb9   :  { %3073 = vst [vmem:[#allocation52_spill] sm:$0xff] %v2387_v53 }
  0xba   :  { %3074 = vst [vmem:[#allocation53_spill] sm:$0xff] %v2390_v61 }
  0xbb   :  { %3075 = vst [vmem:[#allocation54_spill] sm:$0xff] %v2392_v56  ;;  %v173_v56 = vadd.f32 %v172_v19, %v64_v4 }
  0xbc   :  { %3076 = vst [vmem:[#allocation55_spill] sm:$0xff] %v2394_v52 }
  0xbe   :  { %v228_v55 = vpop.f32.mrf.mxu2  ;;  %v269_v59 = vpop.f32.mrf.mxu3 }
  0xbf   :  { %v2397_v6 = vadd.f32 %v228_v55, %v2352_v58  ;;  %v2400_v32 = vadd.f32 %v269_v59, %v2354_v1  ;;  %v149_v45 = vpop.f32.mrf.mxu0  ;;  %v190_v3 = vpop.f32.mrf.mxu1 }
  0xc0   :  { %v2402_v53 = vadd.f32 %v149_v45, %v63_v2  ;;  %v2404_v54 = vadd.f32 %v190_v3, %v64_v4 }
  0xc1   :  { %3077 = vst [vmem:[#allocation56_spill] sm:$0xff] %v2397_v6 }
  0xc2   :  { %3078 = vst [vmem:[#allocation57_spill] sm:$0xff] %v2400_v32  ;;  %v132_v32 = vadd.f32 %v131_v0, %v63_v2 }
  0xc3   :  { %3079 = vst [vmem:[#allocation58_spill] sm:$0xff] %v2402_v53 }
  0xc4   :  { %3080 = vst [vmem:[#allocation59_spill] sm:$0xff] %v2404_v54 }
  0xc6   :  { %v231_v61 = vpop.f32.mrf.mxu2  ;;  %v272_v62 = vpop.f32.mrf.mxu3 }
  0xc7   :  { %v2407_v60 = vadd.f32 %v231_v61, %v2352_v58  ;;  %v2410_v57 = vadd.f32 %v272_v62, %v2354_v1  ;;  %v152_v52 = vpop.f32.mrf.mxu0  ;;  %v193_v55 = vpop.f32.mrf.mxu1 }
  0xc8   :  { %v2412_v6 = vadd.f32 %v152_v52, %v63_v2  ;;  %v2414_v59 = vadd.f32 %v193_v55, %v64_v4  ;;  %v214_v52 = vadd.f32 %v2344_v63, %v2352_v58 }
  0xc9   :  { %3081 = vst [vmem:[#allocation60_spill] sm:$0xff] %v2407_v60 }
  0xca   :  { %3082 = vst [vmem:[#allocation61_spill] sm:$0xff] %v2410_v57 }
  0xcb   :  { %3083 = vst [vmem:[#allocation62_spill] sm:$0xff] %v2412_v6 }
  0xcc   :  { %3084 = vst [vmem:[#allocation63_spill] sm:$0xff] %v2414_v59 }
  0xce   :  { %v234_v45 = vpop.f32.mrf.mxu2  ;;  %v275_v53 = vpop.f32.mrf.mxu3 }
  0xcf   :  { %v2417_v3 = vadd.f32 %v234_v45, %v2352_v58  ;;  %v2420_v54 = vadd.f32 %v275_v53, %v2354_v1  ;;  %v361_v61 = vpop.f32.mrf.mxu0  ;;  %v381_v60 = vpop.f32.mrf.mxu1 }
  0xd0   :  { %v424_v62 = vadd.f32 %v361_v61, %v132_v32  ;;  %v425_v57 = vadd.f32 %v381_v60, %v173_v56  ;;  %v255_v56 = vadd.f32 %v2346_v5, %v2354_v1 }
  0xd1   :  { %3085 = vst [vmem:[#allocation64_spill] sm:$0xff] %v2417_v3 }
  0xd2   :  { %3086 = vst [vmem:[#allocation65_spill] sm:$0xff] %v2420_v54  ;;  %v1605_v51 = vmul.f32 -1.442695, %v424_v62  ;;  %v1606_v50 = vmul.f32 -1.442695, %v425_v57 }
  0xd4   :  { %1636 = vpow2.f32 %v1605_v51 }
  0xd5   :  { %1638 = vpow2.f32 %v1606_v50 }
  0xd6   :  { %v401_v0 = vpop.f32.mrf.mxu2  ;;  %v421_v54 = vpop.f32.mrf.mxu3 }
  0xd7   :  { %v426_v2 = vadd.f32 %v401_v0, %v214_v52  ;;  %v427_v57 = vadd.f32 %v421_v54, %v255_v56 }
  0xd9   :  { %v1607_v4 = vmul.f32 -1.442695, %v426_v2 }
  0xda   :  { %v1637_v19 = vpop.eup %1636 }
  0xdb   :  { %v1639_v55 = vpop.eup %1638  ;;  %v431_v45 = vadd.f32 1.0, %v1637_v19  ;;  %1640 = vpow2.f32 %v1607_v4 }
  0xdc   :  { %v450_v53 = vadd.f32 1.0, %v1639_v55 }
  0xdd   :  { %1642 = vrcp.f32 %v431_v45  ;;  %v443_v52 = vand.u32 2147483648, %v431_v45  ;;  %v441_v4 = vand.u32 2147483647, %v431_v45  ;;  %vm437_vm4 = vweird.f32 %v431_v45 }
  0xde   :  { %1644 = vrcp.f32 %v450_v53  ;;  %v462_v0 = vand.u32 2147483648, %v450_v53  ;;  %v460_v55 = vand.u32 2147483647, %v450_v53  ;;  %vm456_vm5 = vweird.f32 %v450_v53 }
  0xdf   :  { %v444_v54 = vor.u32 1.1754944e-38, %v443_v52  ;;  %vm442_vm8 = vcmp.eq.f32.partialorder %v441_v4, 8.507059e+37 }
  0xe0   :  { %v463_v56 = vor.u32 1.1754944e-38, %v462_v0  ;;  %vm461_vm9 = vcmp.eq.f32.partialorder %v460_v55, 8.507059e+37 }
  0xe1   :  { %v1641_v32 = vpop.eup %1640 }
  0xe2   :  { %v469_v51 = vadd.f32 1.0, %v1641_v32 }
  0xe3   :  { %v1643_v60 = vpop.eup %1642 }
  0xe4   :  { %v1645_v63 = vpop.eup %1644  ;;  %v433_v50 = vmul.f32 %v1643_v60, %v431_v45  ;;  %1646 = vrcp.f32 %v469_v51  ;;  %vm438_vm2 = vweird.f32 %v1643_v60  ;;  %v481_v0 = vand.u32 2147483648, %v469_v51 }
  0xe5   :  { %v452_v58 = vmul.f32 %v1645_v63, %v450_v53  ;;  %1648 = vtanh.f32 %v427_v57  ;;  %vm457_vm3 = vweird.f32 %v1645_v63  ;;  %vm439_vm6 = vmor %vm437_vm4, %vm438_vm2  ;;  %v49_v57 = vld [vmem:[%s2941_s2] sm:$0xff]  ;;  %vm475_vm11 = vweird.f32 %v469_v51  ;;  %s1909_s2 = smov [#allocation8]  }
  0xe6   :  { %v434_v61 = vsub.f32 1.0, %v433_v50  ;;  %vm458_vm7 = vmor %vm456_vm5, %vm457_vm3  ;;  %v482_v4 = vor.u32 1.1754944e-38, %v481_v0  ;;  %s1552_s29 = sshll.u32 %s1909_s2, 4  ;;  %s1553_s29 = int_to_ptr.vmem [resolvable:$true] %s1552_s29 }
  0xe7   :  { %v453_v62 = vsub.f32 1.0, %v452_v58 }
  0xe8   :  { %v435_v2 = vmul.f32 %v1643_v60, %v434_v61 }
  0xe9   :  { %v454_v19 = vmul.f32 %v1645_v63, %v453_v62 }
  0xea   :  { %v1647_v3 = vpop.eup %1646  ;;  %v436_v1 = vadd.f32 %v1643_v60, %v435_v2 }
  0xeb   :  { %v471_v5 = vmul.f32 %v1647_v3, %v469_v51  ;;  %v455_v32 = vadd.f32 %v1645_v63, %v454_v19  ;;  %v1649_v58 = vpop.eup %1648  ;;  %vm476_vm10 = vweird.f32 %v1647_v3  ;;  %v479_v19 = vand.u32 2147483647, %v469_v51 }
  0xec   :  { %v440_v50 = vsel %vm439_vm6, %v1643_v60, %v436_v1  ;;  %vm477_vm12 = vmor %vm475_vm11, %vm476_vm10 }
  0xed   :  { %v472_v61 = vsub.f32 1.0, %v471_v5  ;;  %v445_v62 = vsel %vm442_vm8, %v444_v54, %v440_v50  ;;  %v459_v59 = vsel %vm458_vm7, %v1645_v63, %v455_v32  ;;  %vm480_vm13 = vcmp.eq.f32.partialorder %v479_v19, 8.507059e+37  ;;  %v3115_v32 = vld [vmem:[#allocation41_spill] sm:$0xff] }
  0xee   :  { %v464_v2 = vsel %vm461_vm9, %v463_v56, %v459_v59  ;;  %v487_v45 = vmul.f32 %v1649_v58, %v445_v62 }
  0xef   :  { %v473_v53 = vmul.f32 %v1647_v3, %v472_v61  ;;  %v486_v6 = vmul.f32 %v464_v2, %v49_v57 }
  0xf1   :  { %v2429_v49 = vadd.f32 %v487_v45, %v486_v6  ;;  %v474_v52 = vadd.f32 %v1647_v3, %v473_v53 }
  0xf3   :  { %1650 = vtanh.f32 %v2429_v49  ;;  %v478_v60 = vsel %vm477_vm12, %v1647_v3, %v474_v52 }
  0xf4   :  { %v483_v63 = vsel %vm480_vm13, %v482_v4, %v478_v60 }
  0xf9   :  { %v1651_v1 = vpop.eup %1650 }
  0xfa   :  { %v490_v55 = vmul.f32 %v1651_v1, %v483_v63 }
  0xfc   :  { %507 = vmatmul.f32.vlgmr.msra.gmra.mxu0 %v490_v55  ;;  %1522 = vst [vmem:[#allocation7] sm:$0xff] %v490_v55  ;;  %527 = vmatmul.f32.vlgmr.msra.gmra.mxu1 %v490_v55 }
  0xfd   :  { %547 = vmatmul.f32.vlgmr.msra.gmra.mxu2 %v490_v55  ;;  %567 = vmatmul.f32.vlgmr.msra.gmra.mxu3 %v490_v55 }
  0xfe   :  { %785 = vmatpush.msra.mxu0 %v1965_v7  ;;  %805 = vmatpush.msra.mxu1 %v1967_v8  ;;  %v3087_v7 = vld [vmem:[#allocation13_spill] sm:$0xff]  ;;  %v3088_v8 = vld [vmem:[#allocation14_spill] sm:$0xff] }
  0xff   :  { %825 = vmatpush.msra.mxu2 %v1971_v9  ;;  %845 = vmatpush.msra.mxu3 %v1973_v10  ;;  %v3089_v9 = vld [vmem:[#allocation15_spill] sm:$0xff]  ;;  %v3090_v10 = vld [vmem:[#allocation16_spill] sm:$0xff] }
 0x100   :  { %786 = vmatpush.msra.mxu0 %v1977_v11  ;;  %806 = vmatpush.msra.mxu1 %v1979_v12  ;;  %v3091_v11 = vld [vmem:[#allocation17_spill] sm:$0xff]  ;;  %v3092_v12 = vld [vmem:[#allocation18_spill] sm:$0xff] }
 0x101   :  { %826 = vmatpush.msra.mxu2 %v1983_v13  ;;  %846 = vmatpush.msra.mxu3 %v1985_v14  ;;  %v3093_v13 = vld [vmem:[#allocation19_spill] sm:$0xff]  ;;  %v3094_v14 = vld [vmem:[#allocation20_spill] sm:$0xff] }
 0x102   :  { %787 = vmatpush.msra.mxu0 %v1988_v15  ;;  %807 = vmatpush.msra.mxu1 %v1990_v16  ;;  %v3095_v15 = vld [vmem:[#allocation21_spill] sm:$0xff]  ;;  %v3096_v16 = vld [vmem:[#allocation22_spill] sm:$0xff] }
 0x103   :  { %827 = vmatpush.msra.mxu2 %v1995_v17  ;;  %847 = vmatpush.msra.mxu3 %v1997_v18  ;;  %v3097_v17 = vld [vmem:[#allocation23_spill] sm:$0xff]  ;;  %v3098_v18 = vld [vmem:[#allocation24_spill] sm:$0xff] }
 0x104   :  { %788 = vmatpush.msra.mxu0 %v2006_v20  ;;  %808 = vmatpush.msra.mxu1 %v2008_v21  ;;  %v3099_v20 = vld [vmem:[#allocation25_spill] sm:$0xff]  ;;  %v3100_v21 = vld [vmem:[#allocation26_spill] sm:$0xff] }
 0x105   :  { %828 = vmatpush.msra.mxu2 %v2014_v22  ;;  %848 = vmatpush.msra.mxu3 %v2016_v23  ;;  %v3101_v22 = vld [vmem:[#allocation27_spill] sm:$0xff]  ;;  %v3102_v23 = vld [vmem:[#allocation28_spill] sm:$0xff] }
 0x106   :  { %789 = vmatpush.msra.mxu0 %v2020_v24  ;;  %809 = vmatpush.msra.mxu1 %v2022_v25  ;;  %v3103_v24 = vld [vmem:[#allocation29_spill] sm:$0xff]  ;;  %v3104_v25 = vld [vmem:[#allocation30_spill] sm:$0xff] }
 0x107   :  { %829 = vmatpush.msra.mxu2 %v2026_v26  ;;  %849 = vmatpush.msra.mxu3 %v2028_v27  ;;  %v3105_v26 = vld [vmem:[#allocation31_spill] sm:$0xff]  ;;  %v3106_v27 = vld [vmem:[#allocation32_spill] sm:$0xff] }
 0x108   :  { %790 = vmatpush.msra.mxu0 %v2031_v28  ;;  %810 = vmatpush.msra.mxu1 %v2033_v29  ;;  %v3107_v28 = vld [vmem:[#allocation33_spill] sm:$0xff]  ;;  %v3108_v29 = vld [vmem:[#allocation34_spill] sm:$0xff] }
 0x109   :  { %830 = vmatpush.msra.mxu2 %v2038_v30  ;;  %850 = vmatpush.msra.mxu3 %v2040_v31  ;;  %v3109_v30 = vld [vmem:[#allocation35_spill] sm:$0xff]  ;;  %v3110_v31 = vld [vmem:[#allocation36_spill] sm:$0xff] }
 0x10a   :  { %791 = vmatpush.msra.mxu0 %v2049_v33  ;;  %811 = vmatpush.msra.mxu1 %v2051_v34  ;;  %v3111_v33 = vld [vmem:[#allocation37_spill] sm:$0xff] }
 0x10b   :  { %831 = vmatpush.msra.mxu2 %v2057_v35  ;;  %851 = vmatpush.msra.mxu3 %v2059_v36  ;;  %v3112_v36 = vld [vmem:[#allocation38_spill] sm:$0xff] }
 0x10c   :  { %792 = vmatpush.msra.mxu0 %v2063_v37  ;;  %812 = vmatpush.msra.mxu1 %v2065_v38  ;;  %v3113_v38 = vld [vmem:[#allocation39_spill] sm:$0xff] }
 0x10d   :  { %832 = vmatpush.msra.mxu2 %v2069_v39  ;;  %852 = vmatpush.msra.mxu3 %v2071_v40 }
 0x10e   :  { %793 = vmatpush.msra.mxu0 %v2074_v41  ;;  %813 = vmatpush.msra.mxu1 %v2076_v42 }
 0x10f   :  { %833 = vmatpush.msra.mxu2 %v2081_v43  ;;  %853 = vmatpush.msra.mxu3 %v2083_v44  ;;  %v3114_v43 = vld [vmem:[#allocation40_spill] sm:$0xff] }
 0x110   :  { %794 = vmatpush.msra.mxu0 %v2092_v46  ;;  %814 = vmatpush.msra.mxu1 %v2094_v47 }
 0x111   :  { %834 = vmatpush.msra.mxu2 %v2100_v48  ;;  %854 = vmatpush.msra.mxu3 %v3087_v7 }
 0x112   :  { %795 = vmatpush.msra.mxu0 %v3088_v8  ;;  %815 = vmatpush.msra.mxu1 %v3089_v9 }
 0x113   :  { %835 = vmatpush.msra.mxu2 %v3090_v10  ;;  %855 = vmatpush.msra.mxu3 %v3091_v11 }
 0x114   :  { %796 = vmatpush.msra.mxu0 %v3092_v12  ;;  %816 = vmatpush.msra.mxu1 %v3093_v13 }
 0x115   :  { %836 = vmatpush.msra.mxu2 %v3094_v14  ;;  %856 = vmatpush.msra.mxu3 %v3095_v15 }
 0x116   :  { %797 = vmatpush.msra.mxu0 %v3096_v16  ;;  %817 = vmatpush.msra.mxu1 %v3097_v17 }
 0x117   :  { %837 = vmatpush.msra.mxu2 %v3098_v18  ;;  %857 = vmatpush.msra.mxu3 %v3099_v20 }
 0x118   :  { %798 = vmatpush.msra.mxu0 %v3100_v21  ;;  %818 = vmatpush.msra.mxu1 %v3101_v22 }
 0x119   :  { %838 = vmatpush.msra.mxu2 %v3102_v23  ;;  %858 = vmatpush.msra.mxu3 %v3103_v24 }
 0x11a   :  { %799 = vmatpush.msra.mxu0 %v3104_v25  ;;  %819 = vmatpush.msra.mxu1 %v3105_v26 }
 0x11b   :  { %839 = vmatpush.msra.mxu2 %v3106_v27  ;;  %859 = vmatpush.msra.mxu3 %v3107_v28  ;;  %v2507_v27 = vld [vmem:[#allocation4 + $0x1e8] sm:$0xff]  ;;  %v2510_v28 = vld [vmem:[#allocation4 + $0x1f0] sm:$0xff] }
 0x11c   :  { %800 = vmatpush.msra.mxu0 %v3108_v29  ;;  %820 = vmatpush.msra.mxu1 %v3109_v30 }
 0x11d   :  { %840 = vmatpush.msra.mxu2 %v3110_v31  ;;  %860 = vmatpush.msra.mxu3 %v3111_v33 }
 0x179   :  { %v508_v34 = vpop.f32.mrf.mxu0  ;;  %v528_v35 = vpop.f32.mrf.mxu1 }
 0x17a   :  { %v571_v37 = vadd.f32 %v508_v34, %v3112_v36  ;;  %v572_v39 = vadd.f32 %v528_v35, %v3113_v38  ;;  %v2513_v34 = vld [vmem:[#allocation4 + $0x1f8] sm:$0xff]  ;;  %v2516_v35 = vld [vmem:[#allocation4 + $0x1c0] sm:$0xff]  ;;  %v2519_v36 = vld [vmem:[#allocation4 + $0x1c8] sm:$0xff] }
 0x17b   :  { %v2525_v38 = vld [vmem:[#allocation4 + $0x1d8] sm:$0xff] }
 0x17c   :  { %v1608_v40 = vmul.f32 -1.442695, %v571_v37  ;;  %v1609_v41 = vmul.f32 -1.442695, %v572_v39  ;;  %v2522_v37 = vld [vmem:[#allocation4 + $0x1d0] sm:$0xff]  ;;  %v2528_v39 = vld [vmem:[#allocation4 + $0x1a0] sm:$0xff] }
 0x17e   :  { %1652 = vpow2.f32 %v1608_v40  ;;  %v2531_v40 = vld [vmem:[#allocation4 + $0x1a8] sm:$0xff] }
 0x17f   :  { %1654 = vpow2.f32 %v1609_v41  ;;  %v2534_v41 = vld [vmem:[#allocation4 + $0x1b0] sm:$0xff] }
 0x180   :  { %v548_v42 = vpop.f32.mrf.mxu2  ;;  %v568_v3 = vpop.f32.mrf.mxu3 }
 0x181   :  { %v573_v44 = vadd.f32 %v548_v42, %v3114_v43  ;;  %v574_v56 = vadd.f32 %v568_v3, %v3115_v32  ;;  %v2537_v42 = vld [vmem:[#allocation4 + $0x1b8] sm:$0xff]  ;;  %v2540_v43 = vld [vmem:[#allocation4 + $0x180] sm:$0xff] }
 0x182   :  { %v2561_v3 = vld [vmem:[#allocation4 + $0x178] sm:$0xff] }
 0x183   :  { %v1610_v46 = vmul.f32 -1.442695, %v573_v44  ;;  %v2543_v44 = vld [vmem:[#allocation4 + $0x188] sm:$0xff]  ;;  %v2573_v32 = vld [vmem:[#allocation4 + $0x158] sm:$0xff] }
 0x184   :  { %v1653_v47 = vpop.eup %1652 }
 0x185   :  { %v1655_v48 = vpop.eup %1654  ;;  %v578_v6 = vadd.f32 1.0, %v1653_v47  ;;  %1656 = vpow2.f32 %v1610_v46  ;;  %v2546_v46 = vld [vmem:[#allocation4 + $0x190] sm:$0xff]  ;;  %v2549_v47 = vld [vmem:[#allocation4 + $0x198] sm:$0xff] }
 0x186   :  { %v597_v59 = vadd.f32 1.0, %v1655_v48  ;;  %v2552_v48 = vld [vmem:[#allocation4 + $0x160] sm:$0xff] }
 0x187   :  { %1658 = vrcp.f32 %v578_v6  ;;  %v590_v2 = vand.u32 2147483648, %v578_v6  ;;  %v588_v52 = vand.u32 2147483647, %v578_v6  ;;  %vm584_vm0 = vweird.f32 %v578_v6 }
 0x188   :  { %1660 = vrcp.f32 %v597_v59  ;;  %v609_v45 = vand.u32 2147483648, %v597_v59  ;;  %v607_v19 = vand.u32 2147483647, %v597_v59  ;;  %vm603_vm1 = vweird.f32 %v597_v59 }
 0x189   :  { %v591_v63 = vor.u32 1.1754944e-38, %v590_v2  ;;  %vm589_vm4 = vcmp.eq.f32.partialorder %v588_v52, 8.507059e+37  ;;  %v2594_v2 = vld [vmem:[#allocation4 + $0x110] sm:$0xff]  ;;  %v2603_v52 = vld [vmem:[#allocation4 + $0xe8] sm:$0xff] }
 0x18a   :  { %v610_v7 = vor.u32 1.1754944e-38, %v609_v45  ;;  %vm608_vm5 = vcmp.eq.f32.partialorder %v607_v19, 8.507059e+37  ;;  %v2597_v45 = vld [vmem:[#allocation4 + $0x118] sm:$0xff] }
 0x18b   :  { %v1657_v51 = vpop.eup %1656  ;;  %v2609_v19 = vld [vmem:[#allocation4 + $0xf8] sm:$0xff] }
 0x18c   :  { %v616_v5 = vadd.f32 1.0, %v1657_v51  ;;  %v2564_v51 = vld [vmem:[#allocation4 + $0x140] sm:$0xff] }
 0x18d   :  { %v1659_v54 = vpop.eup %1658 }
 0x18e   :  { %v1661_v57 = vpop.eup %1660  ;;  %v580_v50 = vmul.f32 %v1659_v54, %v578_v6  ;;  %1662 = vrcp.f32 %v616_v5  ;;  %vm585_vm14 = vweird.f32 %v1659_v54  ;;  %v628_v20 = vand.u32 2147483648, %v616_v5  ;;  %v2555_v6 = vld [vmem:[#allocation4 + $0x168] sm:$0xff] }
 0x18f   :  { %v599_v58 = vmul.f32 %v1661_v57, %v597_v59  ;;  %1664 = vtanh.f32 %v574_v56  ;;  %vm604_vm15 = vweird.f32 %v1661_v57  ;;  %vm586_vm2 = vmor %vm584_vm0, %vm585_vm14  ;;  %vm622_vm7 = vweird.f32 %v616_v5  ;;  %v2558_v59 = vld [vmem:[#allocation4 + $0x170] sm:$0xff]  ;;  %v2576_v56 = vld [vmem:[#allocation4 + $0x120] sm:$0xff] }
 0x190   :  { %v581_v61 = vsub.f32 1.0, %v580_v50  ;;  %vm605_vm3 = vmor %vm603_vm1, %vm604_vm15  ;;  %v626_v21 = vand.u32 2147483647, %v616_v5  ;;  %v629_v23 = vor.u32 1.1754944e-38, %v628_v20  ;;  %v2582_v50 = vld [vmem:[#allocation4 + $0x130] sm:$0xff]  ;;  %v2660_v20 = vld [vmem:[#allocation4 + $0x40] sm:$0xff] }
 0x191   :  { %v600_v62 = vsub.f32 1.0, %v599_v58  ;;  %v2585_v58 = vld [vmem:[#allocation4 + $0x138] sm:$0xff]  ;;  %3130 = vst [vmem:[#allocation27_spill] sm:$0xff] %v2660_v20 }
 0x192   :  { %v582_v53 = vmul.f32 %v1659_v54, %v581_v61  ;;  %vm627_vm9 = vcmp.eq.f32.partialorder %v626_v21, 8.507059e+37  ;;  %v2588_v61 = vld [vmem:[#allocation4 + $0x100] sm:$0xff]  ;;  %v2663_v21 = vld [vmem:[#allocation4 + $0x48] sm:$0xff] }
 0x193   :  { %v601_v0 = vmul.f32 %v1661_v57, %v600_v62  ;;  %v2591_v62 = vld [vmem:[#allocation4 + $0x108] sm:$0xff]  ;;  %3131 = vst [vmem:[#allocation28_spill] sm:$0xff] %v2663_v21 }
 0x194   :  { %v1663_v60 = vpop.eup %1662  ;;  %v583_v4 = vadd.f32 %v1659_v54, %v582_v53  ;;  %v2600_v53 = vld [vmem:[#allocation4 + $0xe0] sm:$0xff] }
 0x195   :  { %v618_v1 = vmul.f32 %v1663_v60, %v616_v5  ;;  %v602_v55 = vadd.f32 %v1661_v57, %v601_v0  ;;  %v1665_v9 = vpop.eup %1664  ;;  %vm623_vm6 = vweird.f32 %v1663_v60  ;;  %v2567_v5 = vld [vmem:[#allocation4 + $0x148] sm:$0xff]  ;;  %v2606_v0 = vld [vmem:[#allocation4 + $0xf0] sm:$0xff] }
 0x196   :  { %v587_v8 = vsel %vm586_vm2, %v1659_v54, %v583_v4  ;;  %vm624_vm8 = vmor %vm622_vm7, %vm623_vm6  ;;  %v2570_v54 = vld [vmem:[#allocation4 + $0x150] sm:$0xff]  ;;  %v2615_v4 = vld [vmem:[#allocation4 + $0xc8] sm:$0xff] }
 0x197   :  { %v619_v10 = vsub.f32 1.0, %v618_v1  ;;  %v592_v11 = vsel %vm589_vm4, %v591_v63, %v587_v8  ;;  %v606_v12 = vsel %vm605_vm3, %v1661_v57, %v602_v55  ;;  %v2579_v57 = vld [vmem:[#allocation4 + $0x128] sm:$0xff]  ;;  %v2618_v1 = vld [vmem:[#allocation4 + $0xd0] sm:$0xff]  ;;  %v2621_v63 = vld [vmem:[#allocation4 + $0xd8] sm:$0xff] }
 0x198   :  { %v611_v13 = vsel %vm608_vm5, %v610_v7, %v606_v12  ;;  %v634_v14 = vmul.f32 %v1665_v9, %v592_v11  ;;  %3116 = vst [vmem:[#allocation13_spill] sm:$0xff] %v2618_v1  ;;  %v2624_v55 = vld [vmem:[#allocation4 + $0xa0] sm:$0xff]  ;;  %v2627_v7 = vld [vmem:[#allocation4 + $0xa8] sm:$0xff]  ;;  %v2630_v8 = vld [vmem:[#allocation4 + $0xb0] sm:$0xff] }
 0x199   :  { %v620_v15 = vmul.f32 %v1663_v60, %v619_v10  ;;  %v633_v16 = vmul.f32 %v611_v13, %v2429_v49  ;;  %v2504_v49 = vld [vmem:[#allocation4 + $0x1e0] sm:$0xff]  ;;  %3117 = vst [vmem:[#allocation14_spill] sm:$0xff] %v2621_v63  ;;  %v2633_v9 = vld [vmem:[#allocation4 + $0xb8] sm:$0xff]  ;;  %v2639_v11 = vld [vmem:[#allocation4 + $0x88] sm:$0xff] }
 0x19a   :  { %3118 = vst [vmem:[#allocation15_spill] sm:$0xff] %v2624_v55  ;;  %v2636_v10 = vld [vmem:[#allocation4 + $0x80] sm:$0xff]  ;;  %v2642_v12 = vld [vmem:[#allocation4 + $0x90] sm:$0xff]  ;;  %v2645_v13 = vld [vmem:[#allocation4 + $0x98] sm:$0xff] }
 0x19b   :  { %v2501_v17 = vadd.f32 %v634_v14, %v633_v16  ;;  %v621_v18 = vadd.f32 %v1663_v60, %v620_v15  ;;  %3119 = vst [vmem:[#allocation16_spill] sm:$0xff] %v2627_v7  ;;  %v2648_v14 = vld [vmem:[#allocation4 + $0x60] sm:$0xff]  ;;  %v2651_v15 = vld [vmem:[#allocation4 + $0x68] sm:$0xff]  ;;  %v2654_v16 = vld [vmem:[#allocation4 + $0x70] sm:$0xff] }
 0x19c   :  { %3120 = vst [vmem:[#allocation17_spill] sm:$0xff] %v2630_v8 }
 0x19d   :  { %1666 = vtanh.f32 %v2501_v17  ;;  %v625_v22 = vsel %vm624_vm8, %v1663_v60, %v621_v18  ;;  %v2612_v60 = vld [vmem:[#allocation4 + $0xc0] sm:$0xff]  ;;  %3121 = vst [vmem:[#allocation18_spill] sm:$0xff] %v2633_v9  ;;  %v2657_v18 = vld [vmem:[#allocation4 + $0x78] sm:$0xff] }
 0x19e   :  { %v630_v25 = vsel %vm627_vm9, %v629_v23, %v625_v22  ;;  %3122 = vst [vmem:[#allocation19_spill] sm:$0xff] %v2636_v10  ;;  %v2666_v22 = vld [vmem:[#allocation4 + $0x50] sm:$0xff]  ;;  %v2669_v23 = vld [vmem:[#allocation4 + $0x58] sm:$0xff] }
 0x19f   :  { %3123 = vst [vmem:[#allocation20_spill] sm:$0xff] %v2639_v11 }
 0x1a0   :  { %3124 = vst [vmem:[#allocation21_spill] sm:$0xff] %v2642_v12 }
 0x1a1   :  { %3125 = vst [vmem:[#allocation22_spill] sm:$0xff] %v2645_v13 }
 0x1a2   :  { %3126 = vst [vmem:[#allocation23_spill] sm:$0xff] %v2648_v14 }
 0x1a3   :  { %v1667_v24 = vpop.eup %1666  ;;  %3127 = vst [vmem:[#allocation24_spill] sm:$0xff] %v2651_v15 }
 0x1a4   :  { %v637_v26 = vmul.f32 %v1667_v24, %v630_v25  ;;  %3128 = vst [vmem:[#allocation25_spill] sm:$0xff] %v2654_v16  ;;  %v2672_v24 = vld [vmem:[#allocation4 + $0x20] sm:$0xff]  ;;  %v2675_v25 = vld [vmem:[#allocation4 + $0x28] sm:$0xff] }
 0x1a5   :  { %3129 = vst [vmem:[#allocation26_spill] sm:$0xff] %v2657_v18 }
 0x1a6   :  { %654 = vmatmul.f32.vlgmr.msrb.gmra.mxu0 %v637_v26  ;;  %1523 = vst [vmem:[#allocation7 + $0x8] sm:$0xff] %v637_v26  ;;  %674 = vmatmul.f32.vlgmr.msrb.gmra.mxu1 %v637_v26 }
 0x1a7   :  { %694 = vmatmul.f32.vlgmr.msrb.gmra.mxu2 %v637_v26  ;;  %714 = vmatmul.f32.vlgmr.msrb.gmra.mxu3 %v637_v26  ;;  %3132 = vst [vmem:[#allocation29_spill] sm:$0xff] %v2666_v22  ;;  %v2678_v26 = vld [vmem:[#allocation4 + $0x30] sm:$0xff] }
 0x1a8   :  { %932 = vmatpush.msrb.mxu0 %v2504_v49  ;;  %952 = vmatpush.msrb.mxu1 %v2507_v27  ;;  %3133 = vst [vmem:[#allocation30_spill] sm:$0xff] %v2669_v23 }
 0x1a9   :  { %972 = vmatpush.msrb.mxu2 %v2510_v28  ;;  %992 = vmatpush.msrb.mxu3 %v2513_v34  ;;  %3134 = vst [vmem:[#allocation31_spill] sm:$0xff] %v2672_v24 }
 0x1aa   :  { %933 = vmatpush.msrb.mxu0 %v2516_v35  ;;  %953 = vmatpush.msrb.mxu1 %v2519_v36  ;;  %3135 = vst [vmem:[#allocation32_spill] sm:$0xff] %v2675_v25 }
 0x1ab   :  { %973 = vmatpush.msrb.mxu2 %v2522_v37  ;;  %993 = vmatpush.msrb.mxu3 %v2525_v38  ;;  %3136 = vst [vmem:[#allocation33_spill] sm:$0xff] %v2678_v26 }
 0x1ac   :  { %934 = vmatpush.msrb.mxu0 %v2528_v39  ;;  %954 = vmatpush.msrb.mxu1 %v2531_v40 }
 0x1ad   :  { %974 = vmatpush.msrb.mxu2 %v2534_v41  ;;  %994 = vmatpush.msrb.mxu3 %v2537_v42 }
 0x1ae   :  { %935 = vmatpush.msrb.mxu0 %v2540_v43  ;;  %955 = vmatpush.msrb.mxu1 %v2543_v44 }
 0x1af   :  { %975 = vmatpush.msrb.mxu2 %v2546_v46  ;;  %995 = vmatpush.msrb.mxu3 %v2549_v47 }
 0x1b0   :  { %936 = vmatpush.msrb.mxu0 %v2552_v48  ;;  %956 = vmatpush.msrb.mxu1 %v2555_v6 }
 0x1b1   :  { %976 = vmatpush.msrb.mxu2 %v2558_v59  ;;  %996 = vmatpush.msrb.mxu3 %v2561_v3 }
 0x1b2   :  { %937 = vmatpush.msrb.mxu0 %v2564_v51  ;;  %957 = vmatpush.msrb.mxu1 %v2567_v5 }
 0x1b3   :  { %977 = vmatpush.msrb.mxu2 %v2570_v54  ;;  %997 = vmatpush.msrb.mxu3 %v2573_v32 }
 0x1b4   :  { %938 = vmatpush.msrb.mxu0 %v2576_v56  ;;  %958 = vmatpush.msrb.mxu1 %v2579_v57 }
 0x1b5   :  { %978 = vmatpush.msrb.mxu2 %v2582_v50  ;;  %998 = vmatpush.msrb.mxu3 %v2585_v58 }
 0x1b6   :  { %939 = vmatpush.msrb.mxu0 %v2588_v61  ;;  %959 = vmatpush.msrb.mxu1 %v2591_v62 }
 0x1b7   :  { %979 = vmatpush.msrb.mxu2 %v2594_v2  ;;  %999 = vmatpush.msrb.mxu3 %v2597_v45 }
 0x1b8   :  { %940 = vmatpush.msrb.mxu0 %v2600_v53  ;;  %960 = vmatpush.msrb.mxu1 %v2603_v52 }
 0x1b9   :  { %980 = vmatpush.msrb.mxu2 %v2606_v0  ;;  %1000 = vmatpush.msrb.mxu3 %v2609_v19 }
 0x1ba   :  { %941 = vmatpush.msrb.mxu0 %v2612_v60  ;;  %961 = vmatpush.msrb.mxu1 %v2615_v4 }
 0x1bb   :  { %981 = vmatpush.msrb.mxu2 %v2618_v1  ;;  %1001 = vmatpush.msrb.mxu3 %v2621_v63 }
 0x1bc   :  { %942 = vmatpush.msrb.mxu0 %v2624_v55  ;;  %962 = vmatpush.msrb.mxu1 %v2627_v7 }
 0x1bd   :  { %982 = vmatpush.msrb.mxu2 %v2630_v8  ;;  %1002 = vmatpush.msrb.mxu3 %v2633_v9 }
 0x1be   :  { %943 = vmatpush.msrb.mxu0 %v2636_v10  ;;  %963 = vmatpush.msrb.mxu1 %v2639_v11 }
 0x1bf   :  { %983 = vmatpush.msrb.mxu2 %v2642_v12  ;;  %1003 = vmatpush.msrb.mxu3 %v2645_v13 }
 0x1c0   :  { %944 = vmatpush.msrb.mxu0 %v2648_v14  ;;  %964 = vmatpush.msrb.mxu1 %v2651_v15 }
 0x1c1   :  { %984 = vmatpush.msrb.mxu2 %v2654_v16  ;;  %1004 = vmatpush.msrb.mxu3 %v2657_v18 }
 0x1c2   :  { %945 = vmatpush.msrb.mxu0 %v2660_v20  ;;  %965 = vmatpush.msrb.mxu1 %v2663_v21  ;;  %v2681_v21 = vld [vmem:[#allocation4 + $0x38] sm:$0xff] }
 0x1c3   :  { %985 = vmatpush.msrb.mxu2 %v2666_v22  ;;  %1005 = vmatpush.msrb.mxu3 %v2669_v23  ;;  %3137 = vst [vmem:[#allocation34_spill] sm:$0xff] %v2681_v21  ;;  %v3138_v22 = vld [vmem:[#allocation42_spill] sm:$0xff]  ;;  %v3139_v20 = vld [vmem:[#allocation43_spill] sm:$0xff] }
 0x1c4   :  { %946 = vmatpush.msrb.mxu0 %v2672_v24  ;;  %966 = vmatpush.msrb.mxu1 %v2675_v25 }
 0x1c5   :  { %986 = vmatpush.msrb.mxu2 %v2678_v26  ;;  %1006 = vmatpush.msrb.mxu3 %v2681_v21  ;;  %v3140_v21 = vld [vmem:[#allocation44_spill] sm:$0xff] }
 0x1c6   :  { %947 = vmatpush.msrb.mxu0 %v3108_v29  ;;  %967 = vmatpush.msrb.mxu1 %v3109_v30 }
 0x1c7   :  { %987 = vmatpush.msrb.mxu2 %v3110_v31  ;;  %1007 = vmatpush.msrb.mxu3 %v3111_v33 }
 0x223   :  { %v655_v24 = vpop.f32.mrf.mxu0  ;;  %v675_v23 = vpop.f32.mrf.mxu1 }
 0x224   :  { %v718_v25 = vadd.f32 %v655_v24, %v3138_v22  ;;  %v719_v18 = vadd.f32 %v675_v23, %v3139_v20  ;;  %v3141_v20 = vld [vmem:[#allocation45_spill] sm:$0xff] }
 0x226   :  { %v1611_v16 = vmul.f32 -1.442695, %v718_v25  ;;  %v1612_v26 = vmul.f32 -1.442695, %v719_v18 }
 0x228   :  { %1668 = vpow2.f32 %v1611_v16 }
 0x229   :  { %1670 = vpow2.f32 %v1612_v26 }
 0x22a   :  { %v695_v15 = vpop.f32.mrf.mxu2  ;;  %v715_v33 = vpop.f32.mrf.mxu3 }
 0x22b   :  { %v720_v14 = vadd.f32 %v695_v15, %v3140_v21  ;;  %v721_v23 = vadd.f32 %v715_v33, %v3141_v20 }
 0x22d   :  { %v1613_v29 = vmul.f32 -1.442695, %v720_v14 }
 0x22e   :  { %v1669_v13 = vpop.eup %1668 }
 0x22f   :  { %v1671_v30 = vpop.eup %1670  ;;  %v725_v12 = vadd.f32 1.0, %v1669_v13  ;;  %1672 = vpow2.f32 %v1613_v29 }
 0x230   :  { %v744_v31 = vadd.f32 1.0, %v1671_v30 }
 0x231   :  { %1674 = vrcp.f32 %v725_v12  ;;  %v737_v14 = vand.u32 2147483648, %v725_v12  ;;  %v735_v29 = vand.u32 2147483647, %v725_v12  ;;  %vm731_vm12 = vweird.f32 %v725_v12 }
 0x232   :  { %1676 = vrcp.f32 %v744_v31  ;;  %v756_v21 = vand.u32 2147483648, %v744_v31  ;;  %v754_v10 = vand.u32 2147483647, %v744_v31  ;;  %vm750_vm13 = vweird.f32 %v744_v31 }
 0x233   :  { %v738_v20 = vor.u32 1.1754944e-38, %v737_v14  ;;  %vm736_vm0 = vcmp.eq.f32.partialorder %v735_v29, 8.507059e+37 }
 0x234   :  { %vm755_vm1 = vcmp.eq.f32.partialorder %v754_v10, 8.507059e+37 }
 0x235   :  { %v1673_v11 = vpop.eup %1672 }
 0x236   :  { %v763_v22 = vadd.f32 1.0, %v1673_v11 }
 0x237   :  { %v1675_v24 = vpop.eup %1674 }
 0x238   :  { %v1677_v18 = vpop.eup %1676  ;;  %v727_v16 = vmul.f32 %v1675_v24, %v725_v12  ;;  %1678 = vrcp.f32 %v763_v22  ;;  %vm732_vm10 = vweird.f32 %v1675_v24  ;;  %v775_v14 = vand.u32 2147483648, %v763_v22 }
 0x239   :  { %v746_v25 = vmul.f32 %v1677_v18, %v744_v31  ;;  %1680 = vtanh.f32 %v721_v23  ;;  %vm751_vm11 = vweird.f32 %v1677_v18  ;;  %vm733_vm14 = vmor %vm731_vm12, %vm732_vm10  ;;  %vm769_vm3 = vweird.f32 %v763_v22 }
 0x23a   :  { %v728_v26 = vsub.f32 1.0, %v727_v16  ;;  %vm752_vm15 = vmor %vm750_vm13, %vm751_vm11  ;;  %v757_v16 = vor.u32 1.1754944e-38, %v756_v21  ;;  %v776_v29 = vor.u32 1.1754944e-38, %v775_v14  ;;  %v3160_v14 = vld [vmem:[#allocation31_spill] sm:$0xff] }
 0x23b   :  { %v747_v15 = vsub.f32 1.0, %v746_v25 }
 0x23c   :  { %v729_v13 = vmul.f32 %v1675_v24, %v728_v26 }
 0x23d   :  { %v748_v30 = vmul.f32 %v1677_v18, %v747_v15 }
 0x23e   :  { %v1679_v9 = vpop.eup %1678  ;;  %v730_v11 = vadd.f32 %v1675_v24, %v729_v13 }
 0x23f   :  { %v765_v33 = vmul.f32 %v1679_v9, %v763_v22  ;;  %v749_v8 = vadd.f32 %v1677_v18, %v748_v30  ;;  %v1681_v23 = vpop.eup %1680  ;;  %vm770_vm2 = vweird.f32 %v1679_v9  ;;  %v3149_v30 = vld [vmem:[#allocation20_spill] sm:$0xff] }
 0x240   :  { %v734_v25 = vsel %vm733_vm14, %v1675_v24, %v730_v11  ;;  %v773_v24 = vand.u32 2147483647, %v763_v22  ;;  %vm771_vm4 = vmor %vm769_vm3, %vm770_vm2  ;;  %v3147_v22 = vld [vmem:[#allocation18_spill] sm:$0xff]  ;;  %v3150_v11 = vld [vmem:[#allocation21_spill] sm:$0xff] }
 0x241   :  { %v766_v7 = vsub.f32 1.0, %v765_v33  ;;  %v739_v26 = vsel %vm736_vm0, %v738_v20, %v734_v25  ;;  %v753_v55 = vsel %vm752_vm15, %v1677_v18, %v749_v8  ;;  %v3148_v18 = vld [vmem:[#allocation19_spill] sm:$0xff]  ;;  %v3151_v33 = vld [vmem:[#allocation22_spill] sm:$0xff]  ;;  %v3154_v25 = vld [vmem:[#allocation25_spill] sm:$0xff] }
 0x242   :  { %v758_v15 = vsel %vm755_vm1, %v757_v16, %v753_v55  ;;  %v781_v63 = vmul.f32 %v1681_v23, %v739_v26  ;;  %vm774_vm5 = vcmp.eq.f32.partialorder %v773_v24, 8.507059e+37  ;;  %v3152_v20 = vld [vmem:[#allocation23_spill] sm:$0xff]  ;;  %v3153_v16 = vld [vmem:[#allocation24_spill] sm:$0xff]  ;;  %v3155_v23 = vld [vmem:[#allocation26_spill] sm:$0xff] }
 0x243   :  { %v767_v1 = vmul.f32 %v1679_v9, %v766_v7  ;;  %v780_v13 = vmul.f32 %v758_v15, %v2501_v17  ;;  %v3142_v17 = vld [vmem:[#allocation13_spill] sm:$0xff]  ;;  %v3145_v7 = vld [vmem:[#allocation16_spill] sm:$0xff]  ;;  %v3156_v26 = vld [vmem:[#allocation27_spill] sm:$0xff] }
 0x244   :  { %v3157_v15 = vld [vmem:[#allocation28_spill] sm:$0xff] }
 0x245   :  { %v2693_v12 = vadd.f32 %v781_v63, %v780_v13  ;;  %v768_v31 = vadd.f32 %v1679_v9, %v767_v1  ;;  %v3143_v1 = vld [vmem:[#allocation14_spill] sm:$0xff]  ;;  %v3144_v63 = vld [vmem:[#allocation15_spill] sm:$0xff]  ;;  %v3158_v13 = vld [vmem:[#allocation29_spill] sm:$0xff] }
 0x246   :  { %v3161_v24 = vld [vmem:[#allocation32_spill] sm:$0xff] }
 0x247   :  { %1682 = vtanh.f32 %v2693_v12  ;;  %v772_v21 = vsel %vm771_vm4, %v1679_v9, %v768_v31  ;;  %v3146_v9 = vld [vmem:[#allocation17_spill] sm:$0xff]  ;;  %v3159_v31 = vld [vmem:[#allocation30_spill] sm:$0xff] }
 0x248   :  { %v777_v10 = vsel %vm774_vm5, %v776_v29, %v772_v21  ;;  %v3162_v21 = vld [vmem:[#allocation33_spill] sm:$0xff]  ;;  %v3163_v29 = vld [vmem:[#allocation34_spill] sm:$0xff] }
 0x24d   :  { %v1683_v8 = vpop.eup %1682 }
 0x24e   :  { %v784_v55 = vmul.f32 %v1683_v8, %v777_v10  ;;  %v2756_v8 = vld [vmem:[#allocation4] sm:$0xff]  ;;  %v2759_v10 = vld [vmem:[#allocation4 + $0x8] sm:$0xff] }
 0x24f   :  { %3164 = vst [vmem:[#allocation35_spill] sm:$0xff] %v2756_v8 }
 0x250   :  { %801 = vmatmul.f32.vlgmr.msra.gmra.mxu0 %v784_v55  ;;  %1524 = vst [vmem:[#allocation7 + $0x10] sm:$0xff] %v784_v55  ;;  %821 = vmatmul.f32.vlgmr.msra.gmra.mxu1 %v784_v55 }
 0x251   :  { %841 = vmatmul.f32.vlgmr.msra.gmra.mxu2 %v784_v55  ;;  %861 = vmatmul.f32.vlgmr.msra.gmra.mxu3 %v784_v55  ;;  %3165 = vst [vmem:[#allocation36_spill] sm:$0xff] %v2759_v10  ;;  %v2762_v55 = vld [vmem:[#allocation4 + $0x10] sm:$0xff] }
 0x252   :  { %1079 = vmatpush.msra.mxu0 %v2504_v49  ;;  %1099 = vmatpush.msra.mxu1 %v2507_v27  ;;  %3166 = vst [vmem:[#allocation37_spill] sm:$0xff] %v2762_v55 }
 0x253   :  { %1119 = vmatpush.msra.mxu2 %v2510_v28  ;;  %1139 = vmatpush.msra.mxu3 %v2513_v34 }
 0x254   :  { %1080 = vmatpush.msra.mxu0 %v2516_v35  ;;  %1100 = vmatpush.msra.mxu1 %v2519_v36 }
 0x255   :  { %1120 = vmatpush.msra.mxu2 %v2522_v37  ;;  %1140 = vmatpush.msra.mxu3 %v2525_v38 }
 0x256   :  { %1081 = vmatpush.msra.mxu0 %v2528_v39  ;;  %1101 = vmatpush.msra.mxu1 %v2531_v40 }
 0x257   :  { %1121 = vmatpush.msra.mxu2 %v2534_v41  ;;  %1141 = vmatpush.msra.mxu3 %v2537_v42 }
 0x258   :  { %1082 = vmatpush.msra.mxu0 %v2540_v43  ;;  %1102 = vmatpush.msra.mxu1 %v2543_v44 }
 0x259   :  { %1122 = vmatpush.msra.mxu2 %v2546_v46  ;;  %1142 = vmatpush.msra.mxu3 %v2549_v47 }
 0x25a   :  { %1083 = vmatpush.msra.mxu0 %v2552_v48  ;;  %1103 = vmatpush.msra.mxu1 %v2555_v6 }
 0x25b   :  { %1123 = vmatpush.msra.mxu2 %v2558_v59  ;;  %1143 = vmatpush.msra.mxu3 %v2561_v3 }
 0x25c   :  { %1084 = vmatpush.msra.mxu0 %v2564_v51  ;;  %1104 = vmatpush.msra.mxu1 %v2567_v5 }
 0x25d   :  { %1124 = vmatpush.msra.mxu2 %v2570_v54  ;;  %1144 = vmatpush.msra.mxu3 %v2573_v32 }
 0x25e   :  { %1085 = vmatpush.msra.mxu0 %v2576_v56  ;;  %1105 = vmatpush.msra.mxu1 %v2579_v57 }
 0x25f   :  { %1125 = vmatpush.msra.mxu2 %v2582_v50  ;;  %1145 = vmatpush.msra.mxu3 %v2585_v58 }
 0x260   :  { %1086 = vmatpush.msra.mxu0 %v2588_v61  ;;  %1106 = vmatpush.msra.mxu1 %v2591_v62 }
 0x261   :  { %1126 = vmatpush.msra.mxu2 %v2594_v2  ;;  %1146 = vmatpush.msra.mxu3 %v2597_v45 }
 0x262   :  { %1087 = vmatpush.msra.mxu0 %v2600_v53  ;;  %1107 = vmatpush.msra.mxu1 %v2603_v52 }
 0x263   :  { %1127 = vmatpush.msra.mxu2 %v2606_v0  ;;  %1147 = vmatpush.msra.mxu3 %v2609_v19 }
 0x264   :  { %1088 = vmatpush.msra.mxu0 %v2612_v60  ;;  %1108 = vmatpush.msra.mxu1 %v2615_v4 }
 0x265   :  { %1128 = vmatpush.msra.mxu2 %v3142_v17  ;;  %1148 = vmatpush.msra.mxu3 %v3143_v1 }
 0x266   :  { %1089 = vmatpush.msra.mxu0 %v3144_v63  ;;  %1109 = vmatpush.msra.mxu1 %v3145_v7 }
 0x267   :  { %1129 = vmatpush.msra.mxu2 %v3146_v9  ;;  %1149 = vmatpush.msra.mxu3 %v3147_v22 }
 0x268   :  { %1090 = vmatpush.msra.mxu0 %v3148_v18  ;;  %1110 = vmatpush.msra.mxu1 %v3149_v30 }
 0x269   :  { %1130 = vmatpush.msra.mxu2 %v3150_v11  ;;  %1150 = vmatpush.msra.mxu3 %v3151_v33 }
 0x26a   :  { %1091 = vmatpush.msra.mxu0 %v3152_v20  ;;  %1111 = vmatpush.msra.mxu1 %v3153_v16 }
 0x26b   :  { %1131 = vmatpush.msra.mxu2 %v3154_v25  ;;  %1151 = vmatpush.msra.mxu3 %v3155_v23 }
 0x26c   :  { %1092 = vmatpush.msra.mxu0 %v3156_v26  ;;  %1112 = vmatpush.msra.mxu1 %v3157_v15 }
 0x26d   :  { %1132 = vmatpush.msra.mxu2 %v3158_v13  ;;  %1152 = vmatpush.msra.mxu3 %v3159_v31  ;;  %v2765_v31 = vld [vmem:[#allocation4 + $0x18] sm:$0xff] }
 0x26e   :  { %1093 = vmatpush.msra.mxu0 %v3160_v14  ;;  %1113 = vmatpush.msra.mxu1 %v3161_v24  ;;  %3167 = vst [vmem:[#allocation38_spill] sm:$0xff] %v2765_v31  ;;  %v3168_v14 = vld [vmem:[#allocation46_spill] sm:$0xff]  ;;  %v3169_v13 = vld [vmem:[#allocation47_spill] sm:$0xff] }
 0x26f   :  { %1133 = vmatpush.msra.mxu2 %v3162_v21  ;;  %1153 = vmatpush.msra.mxu3 %v3163_v29 }
 0x270   :  { %1094 = vmatpush.msra.mxu0 %v2756_v8  ;;  %1114 = vmatpush.msra.mxu1 %v2759_v10  ;;  %v3170_v10 = vld [vmem:[#allocation48_spill] sm:$0xff] }
 0x271   :  { %1134 = vmatpush.msra.mxu2 %v2762_v55  ;;  %1154 = vmatpush.msra.mxu3 %v2765_v31 }
 0x2cd   :  { %v802_v24 = vpop.f32.mrf.mxu0  ;;  %v822_v21 = vpop.f32.mrf.mxu1 }
 0x2ce   :  { %v865_v29 = vadd.f32 %v802_v24, %v3168_v14  ;;  %v866_v15 = vadd.f32 %v822_v21, %v3169_v13  ;;  %v3171_v13 = vld [vmem:[#allocation49_spill] sm:$0xff] }
 0x2d0   :  { %v1614_v26 = vmul.f32 -1.442695, %v865_v29  ;;  %v1615_v8 = vmul.f32 -1.442695, %v866_v15 }
 0x2d2   :  { %1684 = vpow2.f32 %v1614_v26 }
 0x2d3   :  { %1686 = vpow2.f32 %v1615_v8 }
 0x2d4   :  { %v842_v23 = vpop.f32.mrf.mxu2  ;;  %v862_v31 = vpop.f32.mrf.mxu3 }
 0x2d5   :  { %v867_v25 = vadd.f32 %v842_v23, %v3170_v10  ;;  %v868_v21 = vadd.f32 %v862_v31, %v3171_v13 }
 0x2d7   :  { %v1616_v16 = vmul.f32 -1.442695, %v867_v25 }
 0x2d8   :  { %v1685_v20 = vpop.eup %1684 }
 0x2d9   :  { %v1687_v55 = vpop.eup %1686  ;;  %v872_v33 = vadd.f32 1.0, %v1685_v20  ;;  %1688 = vpow2.f32 %v1616_v16 }
 0x2da   :  { %v891_v11 = vadd.f32 1.0, %v1687_v55 }
 0x2db   :  { %1690 = vrcp.f32 %v872_v33  ;;  %v884_v25 = vand.u32 2147483648, %v872_v33  ;;  %v882_v16 = vand.u32 2147483647, %v872_v33  ;;  %vm878_vm8 = vweird.f32 %v872_v33 }
 0x2dc   :  { %1692 = vrcp.f32 %v891_v11  ;;  %v903_v10 = vand.u32 2147483648, %v891_v11  ;;  %v901_v18 = vand.u32 2147483647, %v891_v11  ;;  %vm897_vm9 = vweird.f32 %v891_v11 }
 0x2dd   :  { %v885_v13 = vor.u32 1.1754944e-38, %v884_v25  ;;  %vm883_vm12 = vcmp.eq.f32.partialorder %v882_v16, 8.507059e+37 }
 0x2de   :  { %vm902_vm13 = vcmp.eq.f32.partialorder %v901_v18, 8.507059e+37 }
 0x2df   :  { %v1689_v30 = vpop.eup %1688 }
 0x2e0   :  { %v910_v14 = vadd.f32 1.0, %v1689_v30 }
 0x2e1   :  { %v1691_v24 = vpop.eup %1690 }
 0x2e2   :  { %v1693_v15 = vpop.eup %1692  ;;  %v874_v26 = vmul.f32 %v1691_v24, %v872_v33  ;;  %1694 = vrcp.f32 %v910_v14  ;;  %vm879_vm6 = vweird.f32 %v1691_v24  ;;  %v922_v25 = vand.u32 2147483648, %v910_v14 }
 0x2e3   :  { %v893_v29 = vmul.f32 %v1693_v15, %v891_v11  ;;  %1696 = vtanh.f32 %v868_v21  ;;  %vm898_vm7 = vweird.f32 %v1693_v15  ;;  %vm880_vm10 = vmor %vm878_vm8, %vm879_vm6  ;;  %vm916_vm15 = vweird.f32 %v910_v14 }
 0x2e4   :  { %v875_v8 = vsub.f32 1.0, %v874_v26  ;;  %vm899_vm11 = vmor %vm897_vm9, %vm898_vm7  ;;  %v904_v26 = vor.u32 1.1754944e-38, %v903_v10  ;;  %v923_v16 = vor.u32 1.1754944e-38, %v922_v25  ;;  %v3190_v25 = vld [vmem:[#allocation31_spill] sm:$0xff] }
 0x2e5   :  { %v894_v23 = vsub.f32 1.0, %v893_v29 }
 0x2e6   :  { %v876_v20 = vmul.f32 %v1691_v24, %v875_v8 }
 0x2e7   :  { %v895_v55 = vmul.f32 %v1693_v15, %v894_v23 }
 0x2e8   :  { %v1695_v22 = vpop.eup %1694  ;;  %v877_v30 = vadd.f32 %v1691_v24, %v876_v20 }
 0x2e9   :  { %v912_v31 = vmul.f32 %v1695_v22, %v910_v14  ;;  %v896_v9 = vadd.f32 %v1693_v15, %v895_v55  ;;  %v1697_v21 = vpop.eup %1696  ;;  %vm917_vm14 = vweird.f32 %v1695_v22  ;;  %v3179_v55 = vld [vmem:[#allocation20_spill] sm:$0xff] }
 0x2ea   :  { %v881_v29 = vsel %vm880_vm10, %v1691_v24, %v877_v30  ;;  %v920_v24 = vand.u32 2147483647, %v910_v14  ;;  %vm918_vm0 = vmor %vm916_vm15, %vm917_vm14  ;;  %v3177_v14 = vld [vmem:[#allocation18_spill] sm:$0xff]  ;;  %v3180_v30 = vld [vmem:[#allocation21_spill] sm:$0xff] }
 0x2eb   :  { %v913_v7 = vsub.f32 1.0, %v912_v31  ;;  %v886_v8 = vsel %vm883_vm12, %v885_v13, %v881_v29  ;;  %v900_v63 = vsel %vm899_vm11, %v1693_v15, %v896_v9  ;;  %v3178_v15 = vld [vmem:[#allocation19_spill] sm:$0xff]  ;;  %v3181_v31 = vld [vmem:[#allocation22_spill] sm:$0xff]  ;;  %v3184_v29 = vld [vmem:[#allocation25_spill] sm:$0xff] }
 0x2ec   :  { %v905_v23 = vsel %vm902_vm13, %v904_v26, %v900_v63  ;;  %v928_v1 = vmul.f32 %v1697_v21, %v886_v8  ;;  %vm921_vm1 = vcmp.eq.f32.partialorder %v920_v24, 8.507059e+37  ;;  %v3182_v13 = vld [vmem:[#allocation23_spill] sm:$0xff]  ;;  %v3183_v26 = vld [vmem:[#allocation24_spill] sm:$0xff]  ;;  %v3185_v21 = vld [vmem:[#allocation26_spill] sm:$0xff] }
 0x2ed   :  { %v914_v17 = vmul.f32 %v1695_v22, %v913_v7  ;;  %v927_v20 = vmul.f32 %v905_v23, %v2693_v12  ;;  %v3172_v12 = vld [vmem:[#allocation13_spill] sm:$0xff]  ;;  %v3175_v7 = vld [vmem:[#allocation16_spill] sm:$0xff]  ;;  %v3186_v8 = vld [vmem:[#allocation27_spill] sm:$0xff] }
 0x2ee   :  { %v3187_v23 = vld [vmem:[#allocation28_spill] sm:$0xff] }
 0x2ef   :  { %v2773_v33 = vadd.f32 %v928_v1, %v927_v20  ;;  %v915_v11 = vadd.f32 %v1695_v22, %v914_v17  ;;  %v3173_v17 = vld [vmem:[#allocation14_spill] sm:$0xff]  ;;  %v3174_v1 = vld [vmem:[#allocation15_spill] sm:$0xff]  ;;  %v3188_v20 = vld [vmem:[#allocation29_spill] sm:$0xff] }
 0x2f0   :  { %v3191_v24 = vld [vmem:[#allocation32_spill] sm:$0xff] }
 0x2f1   :  { %1698 = vtanh.f32 %v2773_v33  ;;  %v919_v10 = vsel %vm918_vm0, %v1695_v22, %v915_v11  ;;  %v3176_v22 = vld [vmem:[#allocation17_spill] sm:$0xff]  ;;  %v3189_v11 = vld [vmem:[#allocation30_spill] sm:$0xff] }
 0x2f2   :  { %v924_v18 = vsel %vm921_vm1, %v923_v16, %v919_v10  ;;  %v3192_v10 = vld [vmem:[#allocation33_spill] sm:$0xff]  ;;  %v3193_v16 = vld [vmem:[#allocation34_spill] sm:$0xff] }
 0x2f7   :  { %v1699_v9 = vpop.eup %1698 }
 0x2f8   :  { %v931_v63 = vmul.f32 %v1699_v9, %v924_v18  ;;  %v3194_v9 = vld [vmem:[#allocation35_spill] sm:$0xff]  ;;  %v3195_v18 = vld [vmem:[#allocation36_spill] sm:$0xff] }
 0x2fa   :  { %948 = vmatmul.f32.vlgmr.msrb.gmra.mxu0 %v931_v63  ;;  %1525 = vst [vmem:[#allocation7 + $0x18] sm:$0xff] %v931_v63  ;;  %968 = vmatmul.f32.vlgmr.msrb.gmra.mxu1 %v931_v63 }
 0x2fb   :  { %988 = vmatmul.f32.vlgmr.msrb.gmra.mxu2 %v931_v63  ;;  %1008 = vmatmul.f32.vlgmr.msrb.gmra.mxu3 %v931_v63  ;;  %v3196_v63 = vld [vmem:[#allocation37_spill] sm:$0xff] }
 0x2fc   :  { %1226 = vmatpush.msrb.mxu0 %v2504_v49  ;;  %1246 = vmatpush.msrb.mxu1 %v2507_v27 }
 0x2fd   :  { %1266 = vmatpush.msrb.mxu2 %v2510_v28  ;;  %1286 = vmatpush.msrb.mxu3 %v2513_v34 }
 0x2fe   :  { %1227 = vmatpush.msrb.mxu0 %v2516_v35  ;;  %1247 = vmatpush.msrb.mxu1 %v2519_v36 }
 0x2ff   :  { %1267 = vmatpush.msrb.mxu2 %v2522_v37  ;;  %1287 = vmatpush.msrb.mxu3 %v2525_v38 }
 0x300   :  { %1228 = vmatpush.msrb.mxu0 %v2528_v39  ;;  %1248 = vmatpush.msrb.mxu1 %v2531_v40 }
 0x301   :  { %1268 = vmatpush.msrb.mxu2 %v2534_v41  ;;  %1288 = vmatpush.msrb.mxu3 %v2537_v42 }
 0x302   :  { %1229 = vmatpush.msrb.mxu0 %v2540_v43  ;;  %1249 = vmatpush.msrb.mxu1 %v2543_v44 }
 0x303   :  { %1269 = vmatpush.msrb.mxu2 %v2546_v46  ;;  %1289 = vmatpush.msrb.mxu3 %v2549_v47 }
 0x304   :  { %1230 = vmatpush.msrb.mxu0 %v2552_v48  ;;  %1250 = vmatpush.msrb.mxu1 %v2555_v6 }
 0x305   :  { %1270 = vmatpush.msrb.mxu2 %v2558_v59  ;;  %1290 = vmatpush.msrb.mxu3 %v2561_v3 }
 0x306   :  { %1231 = vmatpush.msrb.mxu0 %v2564_v51  ;;  %1251 = vmatpush.msrb.mxu1 %v2567_v5 }
 0x307   :  { %1271 = vmatpush.msrb.mxu2 %v2570_v54  ;;  %1291 = vmatpush.msrb.mxu3 %v2573_v32 }
 0x308   :  { %1232 = vmatpush.msrb.mxu0 %v2576_v56  ;;  %1252 = vmatpush.msrb.mxu1 %v2579_v57 }
 0x309   :  { %1272 = vmatpush.msrb.mxu2 %v2582_v50  ;;  %1292 = vmatpush.msrb.mxu3 %v2585_v58 }
 0x30a   :  { %1233 = vmatpush.msrb.mxu0 %v2588_v61  ;;  %1253 = vmatpush.msrb.mxu1 %v2591_v62 }
 0x30b   :  { %1273 = vmatpush.msrb.mxu2 %v2594_v2  ;;  %1293 = vmatpush.msrb.mxu3 %v2597_v45 }
 0x30c   :  { %1234 = vmatpush.msrb.mxu0 %v2600_v53  ;;  %1254 = vmatpush.msrb.mxu1 %v2603_v52 }
 0x30d   :  { %1274 = vmatpush.msrb.mxu2 %v2606_v0  ;;  %1294 = vmatpush.msrb.mxu3 %v2609_v19 }
 0x30e   :  { %1235 = vmatpush.msrb.mxu0 %v2612_v60  ;;  %1255 = vmatpush.msrb.mxu1 %v2615_v4 }
 0x30f   :  { %1275 = vmatpush.msrb.mxu2 %v3172_v12  ;;  %1295 = vmatpush.msrb.mxu3 %v3173_v17 }
 0x310   :  { %1236 = vmatpush.msrb.mxu0 %v3174_v1  ;;  %1256 = vmatpush.msrb.mxu1 %v3175_v7 }
 0x311   :  { %1276 = vmatpush.msrb.mxu2 %v3176_v22  ;;  %1296 = vmatpush.msrb.mxu3 %v3177_v14 }
 0x312   :  { %1237 = vmatpush.msrb.mxu0 %v3178_v15  ;;  %1257 = vmatpush.msrb.mxu1 %v3179_v55 }
 0x313   :  { %1277 = vmatpush.msrb.mxu2 %v3180_v30  ;;  %1297 = vmatpush.msrb.mxu3 %v3181_v31 }
 0x314   :  { %1238 = vmatpush.msrb.mxu0 %v3182_v13  ;;  %1258 = vmatpush.msrb.mxu1 %v3183_v26 }
 0x315   :  { %1278 = vmatpush.msrb.mxu2 %v3184_v29  ;;  %1298 = vmatpush.msrb.mxu3 %v3185_v21  ;;  %v3198_v21 = vld [vmem:[#allocation50_spill] sm:$0xff]  ;;  %v3199_v29 = vld [vmem:[#allocation51_spill] sm:$0xff] }
 0x316   :  { %1239 = vmatpush.msrb.mxu0 %v3186_v8  ;;  %1259 = vmatpush.msrb.mxu1 %v3187_v23  ;;  %v3197_v8 = vld [vmem:[#allocation38_spill] sm:$0xff] }
 0x317   :  { %1279 = vmatpush.msrb.mxu2 %v3188_v20  ;;  %1299 = vmatpush.msrb.mxu3 %v3189_v11 }
 0x318   :  { %1240 = vmatpush.msrb.mxu0 %v3190_v25  ;;  %1260 = vmatpush.msrb.mxu1 %v3191_v24 }
 0x319   :  { %1280 = vmatpush.msrb.mxu2 %v3192_v10  ;;  %1300 = vmatpush.msrb.mxu3 %v3193_v16  ;;  %v3200_v16 = vld [vmem:[#allocation52_spill] sm:$0xff] }
 0x31a   :  { %1241 = vmatpush.msrb.mxu0 %v3194_v9  ;;  %1261 = vmatpush.msrb.mxu1 %v3195_v18 }
 0x31b   :  { %1281 = vmatpush.msrb.mxu2 %v3196_v63  ;;  %1301 = vmatpush.msrb.mxu3 %v3197_v8 }
 0x377   :  { %v949_v23 = vpop.f32.mrf.mxu0  ;;  %v969_v20 = vpop.f32.mrf.mxu1 }
 0x378   :  { %v1012_v11 = vadd.f32 %v949_v23, %v3198_v21  ;;  %v1013_v25 = vadd.f32 %v969_v20, %v3199_v29  ;;  %v3201_v29 = vld [vmem:[#allocation53_spill] sm:$0xff] }
 0x37a   :  { %v1617_v26 = vmul.f32 -1.442695, %v1012_v11  ;;  %v1618_v24 = vmul.f32 -1.442695, %v1013_v25 }
 0x37c   :  { %1700 = vpow2.f32 %v1617_v26 }
 0x37d   :  { %1702 = vpow2.f32 %v1618_v24 }
 0x37e   :  { %v989_v10 = vpop.f32.mrf.mxu2  ;;  %v1009_v8 = vpop.f32.mrf.mxu3 }
 0x37f   :  { %v1014_v13 = vadd.f32 %v989_v10, %v3200_v16  ;;  %v1015_v20 = vadd.f32 %v1009_v8, %v3201_v29 }
 0x381   :  { %v1619_v9 = vmul.f32 -1.442695, %v1014_v13 }
 0x382   :  { %v1701_v31 = vpop.eup %1700 }
 0x383   :  { %v1703_v18 = vpop.eup %1702  ;;  %v1019_v30 = vadd.f32 1.0, %v1701_v31  ;;  %1704 = vpow2.f32 %v1619_v9 }
 0x384   :  { %v1038_v63 = vadd.f32 1.0, %v1703_v18 }
 0x385   :  { %1706 = vrcp.f32 %v1019_v30  ;;  %v1031_v13 = vand.u32 2147483648, %v1019_v30  ;;  %v1029_v9 = vand.u32 2147483647, %v1019_v30  ;;  %vm1025_vm4 = vweird.f32 %v1019_v30 }
 0x386   :  { %1708 = vrcp.f32 %v1038_v63  ;;  %v1050_v16 = vand.u32 2147483648, %v1038_v63  ;;  %v1048_v15 = vand.u32 2147483647, %v1038_v63  ;;  %vm1044_vm5 = vweird.f32 %v1038_v63 }
 0x387   :  { %v1032_v29 = vor.u32 1.1754944e-38, %v1031_v13  ;;  %vm1030_vm8 = vcmp.eq.f32.partialorder %v1029_v9, 8.507059e+37 }
 0x388   :  { %vm1049_vm9 = vcmp.eq.f32.partialorder %v1048_v15, 8.507059e+37 }
 0x389   :  { %v1705_v55 = vpop.eup %1704 }
 0x38a   :  { %v1057_v21 = vadd.f32 1.0, %v1705_v55 }
 0x38b   :  { %v1707_v23 = vpop.eup %1706 }
 0x38c   :  { %v1709_v11 = vpop.eup %1708  ;;  %v1021_v26 = vmul.f32 %v1707_v23, %v1019_v30  ;;  %1710 = vrcp.f32 %v1057_v21  ;;  %vm1026_vm2 = vweird.f32 %v1707_v23  ;;  %v1069_v13 = vand.u32 2147483648, %v1057_v21 }
 0x38d   :  { %v1040_v25 = vmul.f32 %v1709_v11, %v1038_v63  ;;  %1712 = vtanh.f32 %v1015_v20  ;;  %vm1045_vm3 = vweird.f32 %v1709_v11  ;;  %vm1027_vm6 = vmor %vm1025_vm4, %vm1026_vm2  ;;  %vm1063_vm11 = vweird.f32 %v1057_v21 }
 0x38e   :  { %v1022_v24 = vsub.f32 1.0, %v1021_v26  ;;  %vm1046_vm7 = vmor %vm1044_vm5, %vm1045_vm3  ;;  %v1051_v26 = vor.u32 1.1754944e-38, %v1050_v16  ;;  %v1070_v9 = vor.u32 1.1754944e-38, %v1069_v13 }
 0x38f   :  { %v1041_v10 = vsub.f32 1.0, %v1040_v25 }
 0x390   :  { %v1023_v31 = vmul.f32 %v1707_v23, %v1022_v24 }
 0x391   :  { %v1042_v18 = vmul.f32 %v1709_v11, %v1041_v10 }
 0x392   :  { %v1711_v14 = vpop.eup %1710  ;;  %v1024_v55 = vadd.f32 %v1707_v23, %v1023_v31 }
 0x393   :  { %v1059_v8 = vmul.f32 %v1711_v14, %v1057_v21  ;;  %v1043_v22 = vadd.f32 %v1709_v11, %v1042_v18  ;;  %v1713_v20 = vpop.eup %1712  ;;  %vm1064_vm10 = vweird.f32 %v1711_v14 }
 0x394   :  { %v1028_v25 = vsel %vm1027_vm6, %v1707_v23, %v1024_v55  ;;  %v1067_v23 = vand.u32 2147483647, %v1057_v21  ;;  %vm1065_vm12 = vmor %vm1063_vm11, %vm1064_vm10  ;;  %v3231_v55 = vld [vmem:[#allocation57_spill] sm:$0xff] }
 0x395   :  { %v1060_v7 = vsub.f32 1.0, %v1059_v8  ;;  %v1033_v24 = vsel %vm1030_vm8, %v1032_v29, %v1028_v25  ;;  %v1047_v1 = vsel %vm1046_vm7, %v1709_v11, %v1043_v22 }
 0x396   :  { %v1052_v10 = vsel %vm1049_vm9, %v1051_v26, %v1047_v1  ;;  %v1075_v17 = vmul.f32 %v1713_v20, %v1033_v24  ;;  %vm1068_vm13 = vcmp.eq.f32.partialorder %v1067_v23, 8.507059e+37 }
 0x397   :  { %v1061_v12 = vmul.f32 %v1711_v14, %v1060_v7  ;;  %v1074_v31 = vmul.f32 %v1052_v10, %v2773_v33 }
 0x399   :  { %v2845_v30 = vadd.f32 %v1075_v17, %v1074_v31  ;;  %v1062_v63 = vadd.f32 %v1711_v14, %v1061_v12 }
 0x39b   :  { %1714 = vtanh.f32 %v2845_v30  ;;  %v1066_v16 = vsel %vm1065_vm12, %v1711_v14, %v1062_v63 }
 0x39c   :  { %v1071_v15 = vsel %vm1068_vm13, %v1070_v9, %v1066_v16 }
 0x3a1   :  { %v1715_v22 = vpop.eup %1714 }
 0x3a2   :  { %v1078_v1 = vmul.f32 %v1715_v22, %v1071_v15 }
 0x3a4   :  { %1095 = vmatmul.f32.vlgmr.msra.gmra.mxu0 %v1078_v1  ;;  %1526 = vst [vmem:[#allocation7 + $0x20] sm:$0xff] %v1078_v1  ;;  %1115 = vmatmul.f32.vlgmr.msra.gmra.mxu1 %v1078_v1 }
 0x3a5   :  { %1135 = vmatmul.f32.vlgmr.msra.gmra.mxu2 %v1078_v1  ;;  %1155 = vmatmul.f32.vlgmr.msra.gmra.mxu3 %v1078_v1 }
 0x3a6   :  { %1373 = vmatpush.msra.mxu0 %v2504_v49  ;;  %1393 = vmatpush.msra.mxu1 %v2507_v27  ;;  %v3202_v49 = vld [vmem:[#allocation13_spill] sm:$0xff]  ;;  %v3203_v27 = vld [vmem:[#allocation14_spill] sm:$0xff] }
 0x3a7   :  { %1413 = vmatpush.msra.mxu2 %v2510_v28  ;;  %1433 = vmatpush.msra.mxu3 %v2513_v34  ;;  %v3204_v28 = vld [vmem:[#allocation15_spill] sm:$0xff]  ;;  %v3205_v34 = vld [vmem:[#allocation16_spill] sm:$0xff] }
 0x3a8   :  { %1374 = vmatpush.msra.mxu0 %v2516_v35  ;;  %1394 = vmatpush.msra.mxu1 %v2519_v36  ;;  %v3206_v35 = vld [vmem:[#allocation17_spill] sm:$0xff]  ;;  %v3207_v36 = vld [vmem:[#allocation18_spill] sm:$0xff] }
 0x3a9   :  { %1414 = vmatpush.msra.mxu2 %v2522_v37  ;;  %1434 = vmatpush.msra.mxu3 %v2525_v38  ;;  %v3208_v37 = vld [vmem:[#allocation19_spill] sm:$0xff]  ;;  %v3209_v38 = vld [vmem:[#allocation20_spill] sm:$0xff] }
 0x3aa   :  { %1375 = vmatpush.msra.mxu0 %v2528_v39  ;;  %1395 = vmatpush.msra.mxu1 %v2531_v40  ;;  %v3210_v39 = vld [vmem:[#allocation21_spill] sm:$0xff]  ;;  %v3211_v40 = vld [vmem:[#allocation22_spill] sm:$0xff] }
 0x3ab   :  { %1415 = vmatpush.msra.mxu2 %v2534_v41  ;;  %1435 = vmatpush.msra.mxu3 %v2537_v42  ;;  %v3212_v41 = vld [vmem:[#allocation23_spill] sm:$0xff]  ;;  %v3213_v42 = vld [vmem:[#allocation24_spill] sm:$0xff] }
 0x3ac   :  { %1376 = vmatpush.msra.mxu0 %v2540_v43  ;;  %1396 = vmatpush.msra.mxu1 %v2543_v44  ;;  %v3214_v43 = vld [vmem:[#allocation25_spill] sm:$0xff]  ;;  %v3215_v44 = vld [vmem:[#allocation26_spill] sm:$0xff] }
 0x3ad   :  { %1416 = vmatpush.msra.mxu2 %v2546_v46  ;;  %1436 = vmatpush.msra.mxu3 %v2549_v47  ;;  %v3216_v46 = vld [vmem:[#allocation27_spill] sm:$0xff]  ;;  %v3217_v47 = vld [vmem:[#allocation28_spill] sm:$0xff] }
 0x3ae   :  { %1377 = vmatpush.msra.mxu0 %v2552_v48  ;;  %1397 = vmatpush.msra.mxu1 %v2555_v6  ;;  %v3218_v48 = vld [vmem:[#allocation29_spill] sm:$0xff]  ;;  %v3219_v6 = vld [vmem:[#allocation30_spill] sm:$0xff] }
 0x3af   :  { %1417 = vmatpush.msra.mxu2 %v2558_v59  ;;  %1437 = vmatpush.msra.mxu3 %v2561_v3  ;;  %v3220_v59 = vld [vmem:[#allocation31_spill] sm:$0xff]  ;;  %v3221_v3 = vld [vmem:[#allocation32_spill] sm:$0xff] }
 0x3b0   :  { %1378 = vmatpush.msra.mxu0 %v2564_v51  ;;  %1398 = vmatpush.msra.mxu1 %v2567_v5  ;;  %v3222_v51 = vld [vmem:[#allocation33_spill] sm:$0xff]  ;;  %v3223_v5 = vld [vmem:[#allocation34_spill] sm:$0xff] }
 0x3b1   :  { %1418 = vmatpush.msra.mxu2 %v2570_v54  ;;  %1438 = vmatpush.msra.mxu3 %v2573_v32  ;;  %v3224_v54 = vld [vmem:[#allocation35_spill] sm:$0xff]  ;;  %v3225_v32 = vld [vmem:[#allocation36_spill] sm:$0xff] }
 0x3b2   :  { %1379 = vmatpush.msra.mxu0 %v2576_v56  ;;  %1399 = vmatpush.msra.mxu1 %v2579_v57  ;;  %v3226_v56 = vld [vmem:[#allocation37_spill] sm:$0xff]  ;;  %v3227_v57 = vld [vmem:[#allocation38_spill] sm:$0xff] }
 0x3b3   :  { %1419 = vmatpush.msra.mxu2 %v2582_v50  ;;  %1439 = vmatpush.msra.mxu3 %v2585_v58 }
 0x3b4   :  { %1380 = vmatpush.msra.mxu0 %v2588_v61  ;;  %1400 = vmatpush.msra.mxu1 %v2591_v62  ;;  %v3228_v61 = vld [vmem:[#allocation54_spill] sm:$0xff] }
 0x3b5   :  { %1420 = vmatpush.msra.mxu2 %v2594_v2  ;;  %1440 = vmatpush.msra.mxu3 %v2597_v45  ;;  %v3229_v2 = vld [vmem:[#allocation55_spill] sm:$0xff] }
 0x3b6   :  { %1381 = vmatpush.msra.mxu0 %v2600_v53  ;;  %1401 = vmatpush.msra.mxu1 %v2603_v52 }
 0x3b7   :  { %1421 = vmatpush.msra.mxu2 %v2606_v0  ;;  %1441 = vmatpush.msra.mxu3 %v2609_v19  ;;  %v3230_v19 = vld [vmem:[#allocation56_spill] sm:$0xff] }
 0x3b8   :  { %1382 = vmatpush.msra.mxu0 %v2612_v60  ;;  %1402 = vmatpush.msra.mxu1 %v2615_v4 }
 0x3b9   :  { %1422 = vmatpush.msra.mxu2 %v3202_v49  ;;  %1442 = vmatpush.msra.mxu3 %v3203_v27 }
 0x3ba   :  { %1383 = vmatpush.msra.mxu0 %v3204_v28  ;;  %1403 = vmatpush.msra.mxu1 %v3205_v34 }
 0x3bb   :  { %1423 = vmatpush.msra.mxu2 %v3206_v35  ;;  %1443 = vmatpush.msra.mxu3 %v3207_v36 }
 0x3bc   :  { %1384 = vmatpush.msra.mxu0 %v3208_v37  ;;  %1404 = vmatpush.msra.mxu1 %v3209_v38 }
 0x3bd   :  { %1424 = vmatpush.msra.mxu2 %v3210_v39  ;;  %1444 = vmatpush.msra.mxu3 %v3211_v40 }
 0x3be   :  { %1385 = vmatpush.msra.mxu0 %v3212_v41  ;;  %1405 = vmatpush.msra.mxu1 %v3213_v42 }
 0x3bf   :  { %1425 = vmatpush.msra.mxu2 %v3214_v43  ;;  %1445 = vmatpush.msra.mxu3 %v3215_v44 }
 0x3c0   :  { %1386 = vmatpush.msra.mxu0 %v3216_v46  ;;  %1406 = vmatpush.msra.mxu1 %v3217_v47 }
 0x3c1   :  { %1426 = vmatpush.msra.mxu2 %v3218_v48  ;;  %1446 = vmatpush.msra.mxu3 %v3219_v6 }
 0x3c2   :  { %1387 = vmatpush.msra.mxu0 %v3220_v59  ;;  %1407 = vmatpush.msra.mxu1 %v3221_v3 }
 0x3c3   :  { %1427 = vmatpush.msra.mxu2 %v3222_v51  ;;  %1447 = vmatpush.msra.mxu3 %v3223_v5  ;;  %v3232_v5 = vld [vmem:[#allocation58_spill] sm:$0xff] }
 0x3c4   :  { %1388 = vmatpush.msra.mxu0 %v3224_v54  ;;  %1408 = vmatpush.msra.mxu1 %v3225_v32  ;;  %v3233_v32 = vld [vmem:[#allocation59_spill] sm:$0xff] }
 0x3c5   :  { %1428 = vmatpush.msra.mxu2 %v3226_v56  ;;  %1448 = vmatpush.msra.mxu3 %v3227_v57 }
 0x421   :  { %v1096_v50 = vpop.f32.mrf.mxu0  ;;  %v1116_v58 = vpop.f32.mrf.mxu1 }
 0x422   :  { %v1159_v62 = vadd.f32 %v1096_v50, %v3228_v61  ;;  %v1160_v45 = vadd.f32 %v1116_v58, %v3229_v2  ;;  %v3234_v61 = vld [vmem:[#allocation60_spill] sm:$0xff] }
 0x424   :  { %v1620_v53 = vmul.f32 -1.442695, %v1159_v62  ;;  %v1621_v52 = vmul.f32 -1.442695, %v1160_v45 }
 0x426   :  { %1716 = vpow2.f32 %v1620_v53 }
 0x427   :  { %1718 = vpow2.f32 %v1621_v52 }
 0x428   :  { %v1136_v0 = vpop.f32.mrf.mxu2  ;;  %v1156_v14 = vpop.f32.mrf.mxu3 }
 0x429   :  { %v1161_v60 = vadd.f32 %v1136_v0, %v3230_v19  ;;  %v1162_v8 = vadd.f32 %v1156_v14, %v3231_v55 }
 0x42b   :  { %v1622_v4 = vmul.f32 -1.442695, %v1161_v60 }
 0x42c   :  { %v1717_v33 = vpop.eup %1716 }
 0x42d   :  { %v1719_v12 = vpop.eup %1718  ;;  %v1166_v17 = vadd.f32 1.0, %v1717_v33  ;;  %1720 = vpow2.f32 %v1622_v4 }
 0x42e   :  { %v1185_v7 = vadd.f32 1.0, %v1719_v12  ;;  %v3235_v12 = vld [vmem:[#allocation61_spill] sm:$0xff] }
 0x42f   :  { %1722 = vrcp.f32 %v1166_v17  ;;  %v1178_v10 = vand.u32 2147483648, %v1166_v17  ;;  %v1176_v13 = vand.u32 2147483647, %v1166_v17  ;;  %vm1172_vm0 = vweird.f32 %v1166_v17 }
 0x430   :  { %1724 = vrcp.f32 %v1185_v7  ;;  %v1197_v31 = vand.u32 2147483648, %v1185_v7  ;;  %v1195_v16 = vand.u32 2147483647, %v1185_v7  ;;  %vm1191_vm1 = vweird.f32 %v1185_v7 }
 0x431   :  { %v1179_v1 = vor.u32 1.1754944e-38, %v1178_v10  ;;  %vm1177_vm4 = vcmp.eq.f32.partialorder %v1176_v13, 8.507059e+37 }
 0x432   :  { %v1198_v27 = vor.u32 1.1754944e-38, %v1197_v31  ;;  %vm1196_vm5 = vcmp.eq.f32.partialorder %v1195_v16, 8.507059e+37 }
 0x433   :  { %v1721_v21 = vpop.eup %1720 }
 0x434   :  { %v1204_v11 = vadd.f32 1.0, %v1721_v21 }
 0x435   :  { %v1723_v18 = vpop.eup %1722 }
 0x436   :  { %v1725_v29 = vpop.eup %1724  ;;  %v1168_v26 = vmul.f32 %v1723_v18, %v1166_v17  ;;  %1726 = vrcp.f32 %v1204_v11  ;;  %vm1173_vm14 = vweird.f32 %v1723_v18  ;;  %v1216_v44 = vand.u32 2147483648, %v1204_v11 }
 0x437   :  { %v1187_v25 = vmul.f32 %v1725_v29, %v1185_v7  ;;  %1728 = vtanh.f32 %v1162_v8  ;;  %vm1192_vm15 = vweird.f32 %v1725_v29  ;;  %vm1174_vm2 = vmor %vm1172_vm0, %vm1173_vm14  ;;  %vm1210_vm7 = vweird.f32 %v1204_v11 }
 0x438   :  { %v1169_v20 = vsub.f32 1.0, %v1168_v26  ;;  %vm1193_vm3 = vmor %vm1191_vm1, %vm1192_vm15  ;;  %v1214_v46 = vand.u32 2147483647, %v1204_v11  ;;  %v1217_v48 = vor.u32 1.1754944e-38, %v1216_v44 }
 0x439   :  { %v1188_v24 = vsub.f32 1.0, %v1187_v25 }
 0x43a   :  { %v1170_v63 = vmul.f32 %v1723_v18, %v1169_v20  ;;  %vm1215_vm9 = vcmp.eq.f32.partialorder %v1214_v46, 8.507059e+37 }
 0x43b   :  { %v1189_v23 = vmul.f32 %v1725_v29, %v1188_v24 }
 0x43c   :  { %v1727_v9 = vpop.eup %1726  ;;  %v1171_v22 = vadd.f32 %v1723_v18, %v1170_v63 }
 0x43d   :  { %v1206_v15 = vmul.f32 %v1727_v9, %v1204_v11  ;;  %v1190_v49 = vadd.f32 %v1725_v29, %v1189_v23  ;;  %v1729_v34 = vpop.eup %1728  ;;  %vm1211_vm6 = vweird.f32 %v1727_v9 }
 0x43e   :  { %v1175_v28 = vsel %vm1174_vm2, %v1723_v18, %v1171_v22  ;;  %vm1212_vm8 = vmor %vm1210_vm7, %vm1211_vm6 }
 0x43f   :  { %v1207_v35 = vsub.f32 1.0, %v1206_v15  ;;  %v1180_v36 = vsel %vm1177_vm4, %v1179_v1, %v1175_v28  ;;  %v1194_v37 = vsel %vm1193_vm3, %v1725_v29, %v1190_v49 }
 0x440   :  { %v1199_v38 = vsel %vm1196_vm5, %v1198_v27, %v1194_v37  ;;  %v1222_v39 = vmul.f32 %v1729_v34, %v1180_v36 }
 0x441   :  { %v1208_v40 = vmul.f32 %v1727_v9, %v1207_v35  ;;  %v1221_v41 = vmul.f32 %v1199_v38, %v2845_v30 }
 0x443   :  { %v2917_v42 = vadd.f32 %v1222_v39, %v1221_v41  ;;  %v1209_v43 = vadd.f32 %v1727_v9, %v1208_v40 }
 0x445   :  { %1730 = vtanh.f32 %v2917_v42  ;;  %v1213_v47 = vsel %vm1212_vm8, %v1727_v9, %v1209_v43 }
 0x446   :  { %v1218_v59 = vsel %vm1215_vm9, %v1217_v48, %v1213_v47  ;;  %v3236_v47 = vld [vmem:[#allocation62_spill] sm:$0xff] }
 0x44b   :  { %v1731_v6 = vpop.eup %1730 }
 0x44c   :  { %v1225_v3 = vmul.f32 %v1731_v6, %v1218_v59  ;;  %v3237_v6 = vld [vmem:[#allocation63_spill] sm:$0xff] }
 0x44e   :  { %1242 = vmatmul.f32.vlgmr.msrb.gmra.mxu0 %v1225_v3  ;;  %1527 = vst [vmem:[#allocation7 + $0x28] sm:$0xff] %v1225_v3  ;;  %1262 = vmatmul.f32.vlgmr.msrb.gmra.mxu1 %v1225_v3 }
 0x44f   :  { %1282 = vmatmul.f32.vlgmr.msrb.gmra.mxu2 %v1225_v3  ;;  %1302 = vmatmul.f32.vlgmr.msrb.gmra.mxu3 %v1225_v3 }
 0x4cb   :  { %v1243_v30 = vpop.f32.mrf.mxu0  ;;  %v1263_v51 = vpop.f32.mrf.mxu1 }
 0x4cc   :  { %v1306_v54 = vadd.f32 %v1243_v30, %v3232_v5  ;;  %v1307_v56 = vadd.f32 %v1263_v51, %v3233_v32  ;;  %v3238_v5 = vld [vmem:[#allocation64_spill] sm:$0xff] }
 0x4ce   :  { %v1623_v57 = vmul.f32 -1.442695, %v1306_v54  ;;  %v1624_v50 = vmul.f32 -1.442695, %v1307_v56 }
 0x4d0   :  { %1732 = vpow2.f32 %v1623_v57 }
 0x4d1   :  { %1734 = vpow2.f32 %v1624_v50 }
 0x4d2   :  { %v1283_v58 = vpop.f32.mrf.mxu2  ;;  %v1303_v19 = vpop.f32.mrf.mxu3 }
 0x4d3   :  { %v1308_v62 = vadd.f32 %v1283_v58, %v3234_v61  ;;  %v1309_v17 = vadd.f32 %v1303_v19, %v3235_v12 }
 0x4d5   :  { %v1625_v2 = vmul.f32 -1.442695, %v1308_v62 }
 0x4d6   :  { %v1733_v45 = vpop.eup %1732 }
 0x4d7   :  { %v1735_v53 = vpop.eup %1734  ;;  %v1313_v52 = vadd.f32 1.0, %v1733_v45  ;;  %1736 = vpow2.f32 %v1625_v2 }
 0x4d8   :  { %v1332_v0 = vadd.f32 1.0, %v1735_v53  ;;  %v3239_v53 = vld [vmem:[#allocation65_spill] sm:$0xff] }
 0x4d9   :  { %1738 = vrcp.f32 %v1313_v52  ;;  %v1325_v55 = vand.u32 2147483648, %v1313_v52  ;;  %v1323_v26 = vand.u32 2147483647, %v1313_v52  ;;  %vm1319_vm12 = vweird.f32 %v1313_v52 }
 0x4da   :  { %1740 = vrcp.f32 %v1332_v0  ;;  %v1344_v8 = vand.u32 2147483648, %v1332_v0  ;;  %v1342_v20 = vand.u32 2147483647, %v1332_v0  ;;  %vm1338_vm13 = vweird.f32 %v1332_v0 }
 0x4db   :  { %v1326_v63 = vor.u32 1.1754944e-38, %v1325_v55  ;;  %vm1324_vm0 = vcmp.eq.f32.partialorder %v1323_v26, 8.507059e+37 }
 0x4dc   :  { %v1345_v23 = vor.u32 1.1754944e-38, %v1344_v8  ;;  %vm1343_vm1 = vcmp.eq.f32.partialorder %v1342_v20, 8.507059e+37 }
 0x4dd   :  { %v1737_v60 = vpop.eup %1736 }
 0x4de   :  { %v1351_v4 = vadd.f32 1.0, %v1737_v60 }
 0x4df   :  { %v1739_v33 = vpop.eup %1738 }
 0x4e0   :  { %v1741_v7 = vpop.eup %1740  ;;  %v1315_v14 = vmul.f32 %v1739_v33, %v1313_v52  ;;  %1742 = vrcp.f32 %v1351_v4  ;;  %vm1320_vm10 = vweird.f32 %v1739_v33  ;;  %v1363_v37 = vand.u32 2147483648, %v1351_v4 }
 0x4e1   :  { %v1334_v21 = vmul.f32 %v1741_v7, %v1332_v0  ;;  %1744 = vtanh.f32 %v1309_v17  ;;  %vm1339_vm11 = vweird.f32 %v1741_v7  ;;  %vm1321_vm14 = vmor %vm1319_vm12, %vm1320_vm10  ;;  %vm1357_vm3 = vweird.f32 %v1351_v4 }
 0x4e2   :  { %v1316_v11 = vsub.f32 1.0, %v1315_v14  ;;  %vm1340_vm15 = vmor %vm1338_vm13, %vm1339_vm11  ;;  %v1361_v38 = vand.u32 2147483647, %v1351_v4  ;;  %v1364_v40 = vor.u32 1.1754944e-38, %v1363_v37 }
 0x4e3   :  { %v1335_v18 = vsub.f32 1.0, %v1334_v21 }
 0x4e4   :  { %v1317_v29 = vmul.f32 %v1739_v33, %v1316_v11  ;;  %vm1362_vm5 = vcmp.eq.f32.partialorder %v1361_v38, 8.507059e+37 }
 0x4e5   :  { %v1336_v25 = vmul.f32 %v1741_v7, %v1335_v18 }
 0x4e6   :  { %v1743_v24 = vpop.eup %1742  ;;  %v1318_v10 = vadd.f32 %v1739_v33, %v1317_v29 }
 0x4e7   :  { %v1353_v31 = vmul.f32 %v1743_v24, %v1351_v4  ;;  %v1337_v13 = vadd.f32 %v1741_v7, %v1336_v25  ;;  %v1745_v9 = vpop.eup %1744  ;;  %vm1358_vm2 = vweird.f32 %v1743_v24 }
 0x4e8   :  { %v1322_v16 = vsel %vm1321_vm14, %v1739_v33, %v1318_v10  ;;  %vm1359_vm4 = vmor %vm1357_vm3, %vm1358_vm2 }
 0x4e9   :  { %v1354_v22 = vsub.f32 1.0, %v1353_v31  ;;  %v1327_v15 = vsel %vm1324_vm0, %v1326_v63, %v1322_v16  ;;  %v1341_v1 = vsel %vm1340_vm15, %v1741_v7, %v1337_v13 }
 0x4ea   :  { %v1346_v49 = vsel %vm1343_vm1, %v1345_v23, %v1341_v1  ;;  %v1369_v27 = vmul.f32 %v1745_v9, %v1327_v15 }
 0x4eb   :  { %v1355_v28 = vmul.f32 %v1743_v24, %v1354_v22  ;;  %v1368_v34 = vmul.f32 %v1346_v49, %v2917_v42 }
 0x4ed   :  { %v2925_v35 = vadd.f32 %v1369_v27, %v1368_v34  ;;  %v1356_v36 = vadd.f32 %v1743_v24, %v1355_v28 }
 0x4ef   :  { %1746 = vtanh.f32 %v2925_v35  ;;  %v1360_v39 = vsel %vm1359_vm4, %v1743_v24, %v1356_v36 }
 0x4f0   :  { %v1365_v43 = vsel %vm1362_vm5, %v1364_v40, %v1360_v39 }
 0x4f5   :  { %v1747_v41 = vpop.eup %1746 }
 0x4f6   :  { %v1372_v44 = vmul.f32 %v1747_v41, %v1365_v43 }
 0x4f8   :  { %1389 = vmatmul.f32.vlgmr.msra.gmra.mxu0 %v1372_v44  ;;  %1528 = vst [vmem:[#allocation7 + $0x30] sm:$0xff] %v1372_v44  ;;  %1409 = vmatmul.f32.vlgmr.msra.gmra.mxu1 %v1372_v44 }
 0x4f9   :  { %1429 = vmatmul.f32.vlgmr.msra.gmra.mxu2 %v1372_v44  ;;  %1449 = vmatmul.f32.vlgmr.msra.gmra.mxu3 %v1372_v44 }
 0x575   :  { %v1390_v42 = vpop.f32.mrf.mxu0  ;;  %v1410_v46 = vpop.f32.mrf.mxu1 }
 0x576   :  { %v1453_v48 = vadd.f32 %v1390_v42, %v3236_v47  ;;  %v1454_v59 = vadd.f32 %v1410_v46, %v3237_v6 }
 0x578   :  { %v1626_v3 = vmul.f32 -1.442695, %v1453_v48  ;;  %v1627_v30 = vmul.f32 -1.442695, %v1454_v59 }
 0x57a   :  { %1748 = vpow2.f32 %v1626_v3 }
 0x57b   :  { %1750 = vpow2.f32 %v1627_v30 }
 0x57c   :  { %v1430_v51 = vpop.f32.mrf.mxu2  ;;  %v1450_v61 = vpop.f32.mrf.mxu3 }
 0x57d   :  { %v1455_v54 = vadd.f32 %v1430_v51, %v3238_v5  ;;  %v1456_v52 = vadd.f32 %v1450_v61, %v3239_v53 }
 0x57f   :  { %v1628_v32 = vmul.f32 -1.442695, %v1455_v54 }
 0x580   :  { %v1749_v56 = vpop.eup %1748 }
 0x581   :  { %v1751_v57 = vpop.eup %1750  ;;  %v1460_v50 = vadd.f32 1.0, %v1749_v56  ;;  %1752 = vpow2.f32 %v1628_v32 }
 0x582   :  { %v1479_v58 = vadd.f32 1.0, %v1751_v57 }
 0x583   :  { %1754 = vrcp.f32 %v1460_v50  ;;  %v1472_v12 = vand.u32 2147483648, %v1460_v50  ;;  %v1470_v14 = vand.u32 2147483647, %v1460_v50  ;;  %vm1466_vm8 = vweird.f32 %v1460_v50 }
 0x584   :  { %1756 = vrcp.f32 %v1479_v58  ;;  %v1491_v17 = vand.u32 2147483648, %v1479_v58  ;;  %v1489_v11 = vand.u32 2147483647, %v1479_v58  ;;  %vm1485_vm9 = vweird.f32 %v1479_v58 }
 0x585   :  { %v1473_v29 = vor.u32 1.1754944e-38, %v1472_v12  ;;  %vm1471_vm12 = vcmp.eq.f32.partialorder %v1470_v14, 8.507059e+37 }
 0x586   :  { %v1492_v25 = vor.u32 1.1754944e-38, %v1491_v17  ;;  %vm1490_vm13 = vcmp.eq.f32.partialorder %v1489_v11, 8.507059e+37 }
 0x587   :  { %v1753_v62 = vpop.eup %1752 }
 0x588   :  { %v1498_v2 = vadd.f32 1.0, %v1753_v62 }
 0x589   :  { %v1755_v45 = vpop.eup %1754 }
 0x58a   :  { %v1757_v0 = vpop.eup %1756  ;;  %v1462_v19 = vmul.f32 %v1755_v45, %v1460_v50  ;;  %1758 = vrcp.f32 %v1498_v2  ;;  %vm1467_vm6 = vweird.f32 %v1755_v45  ;;  %v1510_v1 = vand.u32 2147483648, %v1498_v2 }
 0x58b   :  { %v1481_v60 = vmul.f32 %v1757_v0, %v1479_v58  ;;  %1760 = vtanh.f32 %v1456_v52  ;;  %vm1486_vm7 = vweird.f32 %v1757_v0  ;;  %vm1468_vm10 = vmor %vm1466_vm8, %vm1467_vm6  ;;  %vm1504_vm15 = vweird.f32 %v1498_v2 }
 0x58c   :  { %v1463_v4 = vsub.f32 1.0, %v1462_v19  ;;  %vm1487_vm11 = vmor %vm1485_vm9, %vm1486_vm7  ;;  %v1508_v49 = vand.u32 2147483647, %v1498_v2  ;;  %v1511_v28 = vor.u32 1.1754944e-38, %v1510_v1 }
 0x58d   :  { %v1482_v33 = vsub.f32 1.0, %v1481_v60 }
 0x58e   :  { %v1464_v7 = vmul.f32 %v1755_v45, %v1463_v4  ;;  %vm1509_vm1 = vcmp.eq.f32.partialorder %v1508_v49, 8.507059e+37 }
 0x58f   :  { %v1483_v21 = vmul.f32 %v1757_v0, %v1482_v33 }
 0x590   :  { %v1759_v18 = vpop.eup %1758  ;;  %v1465_v55 = vadd.f32 %v1755_v45, %v1464_v7 }
 0x591   :  { %v1500_v8 = vmul.f32 %v1759_v18, %v1498_v2  ;;  %v1484_v26 = vadd.f32 %v1757_v0, %v1483_v21  ;;  %v1761_v24 = vpop.eup %1760  ;;  %vm1505_vm14 = vweird.f32 %v1759_v18 }
 0x592   :  { %v1469_v20 = vsel %vm1468_vm10, %v1755_v45, %v1465_v55  ;;  %vm1506_vm0 = vmor %vm1504_vm15, %vm1505_vm14 }
 0x593   :  { %v1501_v10 = vsub.f32 1.0, %v1500_v8  ;;  %v1474_v31 = vsel %vm1471_vm12, %v1473_v29, %v1469_v20  ;;  %v1488_v63 = vsel %vm1487_vm11, %v1757_v0, %v1484_v26 }
 0x594   :  { %v1493_v13 = vsel %vm1490_vm13, %v1492_v25, %v1488_v63  ;;  %v1516_v23 = vmul.f32 %v1761_v24, %v1474_v31 }
 0x595   :  { %v1502_v16 = vmul.f32 %v1759_v18, %v1501_v10  ;;  %v1515_v9 = vmul.f32 %v1493_v13, %v2925_v35 }
 0x597   :  { %v1517_v22 = vadd.f32 %v1516_v23, %v1515_v9  ;;  %v1503_v15 = vadd.f32 %v1759_v18, %v1502_v16 }
 0x599   :  { %1762 = vtanh.f32 %v1517_v22  ;;  %1533 = vst [vmem:[#allocation8] sm:$0xff] %v1517_v22  ;;  %v1507_v27 = vsel %vm1506_vm0, %v1759_v18, %v1503_v15 }
 0x59a   :  { %1557 = dma.vmem_to_hbm [thread:$0]  %s1553_s29, 128, %s1555_s9, [#allocation9]   ;;  %v1512_v35 = vsel %vm1509_vm1, %v1511_v28, %v1507_v27 }
 0x59f   :  { %v1763_v34 = vpop.eup %1762 }
 0x5a0   :  { %v1519_v36 = vmul.f32 %v1763_v34, %v1512_v35 }
 0x5a2   :  { %1529 = vst [vmem:[#allocation7 + $0x38] sm:$0xff] %v1519_v36 }
 0x5a3   :  { %1546 = dma.vmem_to_hbm [thread:$0]  %s1539_s11, 1024, %s1541_s12, [#allocation6], %s1911_s3, %s1911_s3, %s1912_s13  }
 0x5a4   :  { %1902 = dma.done.wait [#allocation6], 1024  }
 0x5a5   :  { %1903 = vsyncadd [#allocation6], 4294966272 }
 0x5a6   :  { %1904 = dma.done.wait [#allocation9], 128  }
 0x5a7   :  { %1905 = vsyncadd [#allocation9], 4294967168 }
 0x5a8   :  { %1566 = vsyncpa [#allocation5], 1 }
 0x5a9   :  { %1567 = vsyncpa [#allocation6], 1 }
 0x5aa   :  { %1568 = vsyncpa [#allocation9], 1 }

</bundles_post_ra>
